<compile_context>
chip_gen: v7x
topology: tpu7x:2x2x1
jax: 0.10.0
libtpu: 0.0.40
codegen_flags: <defaults>
</compile_context>

<pallas_src>
import jax
import jax.numpy as jnp
from jax.experimental import pallas as pl
from jax.experimental.pallas import tpu as pltpu


def _round_up(x, m):
    return ((x + m - 1) // m) * m


def _tpu_generation():
    """(vmem_capacity_bytes, hidden_align, default_batch_tile) with fallbacks."""
    vmem_cap = 64 * 1024 * 1024            # conservative (v7x per-TC) fallback
    try:
        vmem_cap = int(pltpu.get_tpu_info().vmem_capacity_bytes)
    except Exception:
        pass
    kind = ""
    try:
        kind = jax.devices()[0].device_kind.lower()
    except Exception:
        pass
    # v2-v5e MXUs are 128-wide (128 alignment native); v6e/v7x MXU is 2x256^2.
    hidden_align = 128 if any(g in kind for g in ("v2", "v3", "v4", "v5")) else 256
    # 128 MiB parts (v5e/v6e) can afford larger batch tiles than 64 MiB v7x.
    default_tile = 512 if vmem_cap > 64 * 1024 * 1024 else 256
    return vmem_cap, hidden_align, default_tile


def _mlp_proj_kernel(x_ref, w1_ref, b1_ref, w2_ref, b2_ref, w3_ref, b3_ref,
                     scale_ref, u_ref):
    """Fused 3-layer MLP + ReLU + tanh + u_bar scaling, (features, batch) layout.

    x_ref:     (n_p,  TB)  bf16   -- one batch tile of X0
    w1_ref:    (h_p,  n_p) bf16   b1_ref:    (h_p, 1) f32
    w2_ref:    (h_p,  h_p) bf16   b2_ref:    (h_p, 1) f32
    w3_ref:    (o_p,  h_p) bf16   b3_ref:    (o_p, 1) f32
    scale_ref: (o_p,  1)   f32    -- u_bar tiled over the horizon (column)
    u_ref:     (o_p,  TB)         -- U.T tile (batch on lanes -> lane-dense store)
    """
    x = x_ref[...]
    h1 = jnp.dot(w1_ref[...], x, preferred_element_type=jnp.float32) + b1_ref[...]
    h1 = jnp.maximum(h1, 0.0).astype(jnp.bfloat16)   # f32 VPU relu, bf16 MXU operand
    h2 = jnp.dot(w2_ref[...], h1, preferred_element_type=jnp.float32) + b2_ref[...]
    h2 = jnp.maximum(h2, 0.0).astype(jnp.bfloat16)
    o = jnp.dot(w3_ref[...], h2, preferred_element_type=jnp.float32) + b3_ref[...]
    u_ref[...] = (jnp.tanh(o) * scale_ref[...]).astype(u_ref.dtype)  # EUP tanh + VPU scale


def init_params(key, n, hidden_dim, m, tau, u_bar):
    """Unpadded f32 parameters with PyTorch nn.Linear shapes/init convention."""
    out_dim = m * tau
    ks = jax.random.split(key, 6)

    def lin(kw, kb, fan_in, fan_out):
        bound = 1.0 / (fan_in ** 0.5)
        w = jax.random.uniform(kw, (fan_out, fan_in), jnp.float32, -bound, bound)
        b = jax.random.uniform(kb, (fan_out,), jnp.float32, -bound, bound)
        return w, b

    w1, b1 = lin(ks[0], ks[1], n, hidden_dim)
    w2, b2 = lin(ks[2], ks[3], hidden_dim, hidden_dim)
    w3, b3 = lin(ks[4], ks[5], hidden_dim, out_dim)
    # torch: u_bar (m,1) -> u_bar.repeat(tau, batch).T == tile(u_bar, tau) per row,
    # broadcast over the batch (every timestep sees the same per-actuator bound).
    scale = jnp.tile(u_bar.reshape(-1), tau).astype(jnp.float32)   # (m*tau,)
    return (w1, b1, w2, b2, w3, b3, scale)


def pack_params(raw, n, hidden_dim, m, tau, hidden_align=None):
    """Pad feature dims (n->16, hidden->MXU width, out->128); pre-cast weights bf16."""
    w1, b1, w2, b2, w3, b3, scale = raw
    out_dim = m * tau
    if hidden_align is None:
        hidden_align = _tpu_generation()[1]
    n_p = _round_up(n, 16)                 # bf16 sublane pack; full-array W1 block
    h_p = _round_up(hidden_dim, hidden_align)
    o_p = _round_up(out_dim, 128)

    def pad_w(w, rows, cols):
        return jnp.pad(w, ((0, rows - w.shape[0]), (0, cols - w.shape[1]))
                       ).astype(jnp.bfloat16)

    def pad_col(v, rows):
        return jnp.pad(v.astype(jnp.float32), (0, rows - v.shape[0])).reshape(rows, 1)

    return dict(
        w1=pad_w(w1, h_p, n_p), b1=pad_col(b1, h_p),
        w2=pad_w(w2, h_p, h_p), b2=pad_col(b2, h_p),
        w3=pad_w(w3, o_p, h_p), b3=pad_col(b3, o_p),
        scale=pad_col(scale, o_p),
        n=n, out_dim=out_dim,
    )


def projection_nn_forward(X0, packed, *, batch_tile=None, out_dtype=jnp.float32):
    """Pallas forward of projection_NN: X0 (n, batch) -> U.T (m*tau, batch)."""
    n, out_dim = packed["n"], packed["out_dim"]
    w1, b1 = packed["w1"], packed["b1"]
    w2, b2 = packed["w2"], packed["b2"]
    w3, b3 = packed["w3"], packed["b3"]
    scale = packed["scale"]
    h_p, n_p = w1.shape
    o_p = w3.shape[0]

    vmem_cap, _, default_tile = _tpu_generation()
    if batch_tile is None:
        batch_tile = default_tile

    batch = X0.shape[1]
    b128 = _round_up(batch, 128)
    if b128 >= 256:
        # >= 2 grid steps so ("parallel",) shards the batch over v7x's two TCs.
        batch_tile = max(128, (min(batch_tile, b128 // 2) // 128) * 128)
    else:
        batch_tile = 128
    b_p = _round_up(batch, batch_tile)
    grid = (b_p // batch_tile,)

    # Skip the extra pad HBM pass when the caller already supplies padded bf16 X0.
    if X0.shape == (n_p, b_p) and X0.dtype == jnp.bfloat16:
        x = X0
    else:
        x = jnp.pad(X0.astype(jnp.bfloat16),
                    ((0, n_p - X0.shape[0]), (0, b_p - batch)))

    # VMEM budget: single-buffered resident weights + bias/scale columns,
    # double-buffered x/out tiles, f32 intermediates, 2x headroom; cap per
    # generation (v7x has 64 MiB/TC, v5e/v6e 128 MiB).
    weight_bytes = 2 * (h_p * n_p + h_p * h_p + o_p * h_p)
    col_bytes = 4 * 128 * (2 * h_p + 2 * o_p)
    out_itemsize = jnp.dtype(out_dtype).itemsize
    tile_bytes = 2 * (n_p * batch_tile * 2) + 2 * (o_p * batch_tile * out_itemsize)
    interm_bytes = 4 * (h_p * batch_tile * 4)
    vmem_cap_limit = (40 if vmem_cap <= 64 * 1024 * 1024 else 96) * 1024 * 1024
    vmem_limit = min(max(2 * (weight_bytes + col_bytes + tile_bytes + interm_bytes),
                         16 * 1024 * 1024),
                     vmem_cap_limit)

    flops = 2 * b_p * (n_p * h_p + h_p * h_p + h_p * o_p)
    bytes_accessed = (weight_bytes + 4 * (2 * h_p + 2 * o_p)
                      + 2 * n_p * b_p + out_itemsize * o_p * b_p)

    def launch(single_buffer_weights):
        # Invariant operands: constant index_map -> single-buffer them so the
        # resident weight footprint isn't silently doubled by the pipeliner.
        rk = {"pipeline_mode": pl.Buffered(1)} if single_buffer_weights else {}
        resident = lambda i: (0, 0)
        return pl.pallas_call(
            _mlp_proj_kernel,
            out_shape=jax.ShapeDtypeStruct((o_p, b_p), out_dtype),
            grid_spec=pltpu.PrefetchScalarGridSpec(
                num_scalar_prefetch=0,
                grid=grid,
                in_specs=[
                    pl.BlockSpec((n_p, batch_tile), lambda i: (0, i)),  # x batch tile
                    pl.BlockSpec((h_p, n_p), resident, **rk),           # w1
                    pl.BlockSpec((h_p, 1), resident, **rk),             # b1
                    pl.BlockSpec((h_p, h_p), resident, **rk),           # w2
                    pl.BlockSpec((h_p, 1), resident, **rk),             # b2
                    pl.BlockSpec((o_p, h_p), resident, **rk),           # w3
                    pl.BlockSpec((o_p, 1), resident, **rk),             # b3
                    pl.BlockSpec((o_p, 1), resident, **rk),             # scale
                ],
                out_specs=pl.BlockSpec((o_p, batch_tile), lambda i: (0, i)),
            ),
            compiler_params=pltpu.CompilerParams(
                dimension_semantics=("parallel",),   # independent batch tiles
                vmem_limit_bytes=int(vmem_limit),
            ),
            cost_estimate=pl.CostEstimate(
                flops=int(flops),
                transcendentals=int(b_p * o_p),
                bytes_accessed=int(bytes_accessed),
            ),
        )(x, w1, b1, w2, b2, w3, b3, scale)

    try:
        u_t_pad = launch(True)
    except Exception:
        # Fallback for jax versions that reject Buffered(1) single-buffering.
        u_t_pad = launch(False)

    # TODO(synk): the CvxpyLayer QP projection (min ||u - v||^2 s.t. F u <= g + H0 x0)
    # is a differentiable convex-program solve with no Pallas equivalent; U is
    # returned un-projected (== V.T).
    if o_p == out_dim and b_p == batch:
        return u_t_pad
    return u_t_pad[:out_dim, :batch]   # U.T with padded rows/cols sliced off


def _reference_forward(X0, raw):
    """Pure-JAX f32 reference (unpadded) for correctness checking."""
    w1, b1, w2, b2, w3, b3, scale = raw
    h1 = jnp.maximum(w1 @ X0 + b1[:, None], 0.0)
    h2 = jnp.maximum(w2 @ h1 + b2[:, None], 0.0)
    o = w3 @ h2 + b3[:, None]
    return jnp.tanh(o) * scale[:, None]


if __name__ == "__main__":
    # Small synthetic system: n states, m inputs, horizon tau.
    n, m, tau = 4, 2, 4
    hidden_dim = 32
    batch = 8

    key = jax.random.PRNGKey(0)
    k_par, k_x = jax.random.split(key)

    u_bar = jnp.full((m,), 1.5, dtype=jnp.float32)
    raw = init_params(k_par, n, hidden_dim, m, tau, u_bar)
    packed = pack_params(raw, n, hidden_dim, m, tau)

    X0 = jax.random.normal(k_x, (n, batch), dtype=jnp.float32)  # (n, batch)

    U_T = projection_nn_forward(X0, packed)
    U_T = jax.block_until_ready(U_T)

    assert U_T.shape == (m * tau, batch), U_T.shape
    assert bool(jnp.all(jnp.isfinite(U_T)))

    ref = _reference_forward(X0, raw)
    max_err = float(jnp.max(jnp.abs(U_T - ref)))
    assert max_err < 5e-2, f"max_err={max_err}"

    print("KERNEL_OK")
</pallas_src>

<mosaic_0001>
module attributes {stable_mosaic.version = 11 : i64} {
  func.func @_mlp_proj_kernel(%arg0: i32, %arg1: memref<16x128xbf16, #tpu.memory_space<vmem>>, %arg2: memref<256x16xbf16, #tpu.memory_space<vmem>>, %arg3: memref<256x1xf32, #tpu.memory_space<vmem>>, %arg4: memref<256x256xbf16, #tpu.memory_space<vmem>>, %arg5: memref<256x1xf32, #tpu.memory_space<vmem>>, %arg6: memref<128x256xbf16, #tpu.memory_space<vmem>>, %arg7: memref<128x1xf32, #tpu.memory_space<vmem>>, %arg8: memref<128x1xf32, #tpu.memory_space<vmem>>, %arg9: memref<128x128xf32, #tpu.memory_space<vmem>>) attributes {dimension_semantics = [#tpu.dimension_semantics<parallel>], iteration_bounds = array<i64: 1>, scalar_prefetch = 0 : i64, scratch_operands = 0 : i64, tpu.core_type = #tpu.core_type<tc>, window_params = [{transform_indices = @transform_0, window_bounds = array<i64: 16, 128>}, {pipeline_mode = #tpu.pipeline_mode<synchronous>, transform_indices = @transform_1, window_bounds = array<i64: 256, 16>}, {pipeline_mode = #tpu.pipeline_mode<synchronous>, transform_indices = @transform_2, window_bounds = array<i64: 256, 1>}, {pipeline_mode = #tpu.pipeline_mode<synchronous>, transform_indices = @transform_3, window_bounds = array<i64: 256, 256>}, {pipeline_mode = #tpu.pipeline_mode<synchronous>, transform_indices = @transform_4, window_bounds = array<i64: 256, 1>}, {pipeline_mode = #tpu.pipeline_mode<synchronous>, transform_indices = @transform_5, window_bounds = array<i64: 128, 256>}, {pipeline_mode = #tpu.pipeline_mode<synchronous>, transform_indices = @transform_6, window_bounds = array<i64: 128, 1>}, {pipeline_mode = #tpu.pipeline_mode<synchronous>, transform_indices = @transform_7, window_bounds = array<i64: 128, 1>}, {transform_indices = @transform_8, window_bounds = array<i64: 128, 128>}]} {
    %c0 = arith.constant 0 : index
    %c0_0 = arith.constant 0 : index
    %0 = vector.load %arg1[%c0, %c0_0] : memref<16x128xbf16, #tpu.memory_space<vmem>>, vector<16x128xbf16>
    %c0_1 = arith.constant 0 : index
    %c0_2 = arith.constant 0 : index
    %1 = vector.load %arg2[%c0_1, %c0_2] : memref<256x16xbf16, #tpu.memory_space<vmem>>, vector<256x16xbf16>
    %cst = arith.constant dense<0.000000e+00> : vector<256x128xf32>
    %2 = tpu.matmul %1, %0, %cst {dimension_numbers = #tpu.dot_dimension_numbers<[1], [0], [0], [1], [0, 0, 1, 1], [], []>} : vector<256x16xbf16>, vector<16x128xbf16>, vector<256x128xf32> -> vector<256x128xf32>
    %c0_3 = arith.constant 0 : index
    %c0_4 = arith.constant 0 : index
    %3 = vector.load %arg3[%c0_3, %c0_4] : memref<256x1xf32, #tpu.memory_space<vmem>>, vector<256x1xf32>
    %4 = vector.broadcast %3 : vector<256x1xf32> to vector<256x128xf32>
    %5 = arith.addf %2, %4 : vector<256x128xf32>
    %cst_5 = arith.constant 0.000000e+00 : f32
    %6 = vector.broadcast %cst_5 : f32 to vector<256x128xf32>
    %7 = arith.maximumf %5, %6 : vector<256x128xf32>
    %8 = arith.truncf %7 : vector<256x128xf32> to vector<256x128xbf16>
    %c0_6 = arith.constant 0 : index
    %c0_7 = arith.constant 0 : index
    %9 = vector.load %arg4[%c0_6, %c0_7] : memref<256x256xbf16, #tpu.memory_space<vmem>>, vector<256x256xbf16>
    %cst_8 = arith.constant dense<0.000000e+00> : vector<256x128xf32>
    %10 = tpu.matmul %9, %8, %cst_8 {dimension_numbers = #tpu.dot_dimension_numbers<[1], [0], [0], [1], [0, 0, 1, 1], [], []>} : vector<256x256xbf16>, vector<256x128xbf16>, vector<256x128xf32> -> vector<256x128xf32>
    %c0_9 = arith.constant 0 : index
    %c0_10 = arith.constant 0 : index
    %11 = vector.load %arg5[%c0_9, %c0_10] : memref<256x1xf32, #tpu.memory_space<vmem>>, vector<256x1xf32>
    %12 = vector.broadcast %11 : vector<256x1xf32> to vector<256x128xf32>
    %13 = arith.addf %10, %12 : vector<256x128xf32>
    %cst_11 = arith.constant 0.000000e+00 : f32
    %14 = vector.broadcast %cst_11 : f32 to vector<256x128xf32>
    %15 = arith.maximumf %13, %14 : vector<256x128xf32>
    %16 = arith.truncf %15 : vector<256x128xf32> to vector<256x128xbf16>
    %c0_12 = arith.constant 0 : index
    %c0_13 = arith.constant 0 : index
    %17 = vector.load %arg6[%c0_12, %c0_13] : memref<128x256xbf16, #tpu.memory_space<vmem>>, vector<128x256xbf16>
    %cst_14 = arith.constant dense<0.000000e+00> : vector<128x128xf32>
    %18 = tpu.matmul %17, %16, %cst_14 {dimension_numbers = #tpu.dot_dimension_numbers<[1], [0], [0], [1], [0, 0, 1, 1], [], []>} : vector<128x256xbf16>, vector<256x128xbf16>, vector<128x128xf32> -> vector<128x128xf32>
    %c0_15 = arith.constant 0 : index
    %c0_16 = arith.constant 0 : index
    %19 = vector.load %arg7[%c0_15, %c0_16] : memref<128x1xf32, #tpu.memory_space<vmem>>, vector<128x1xf32>
    %20 = vector.broadcast %19 : vector<128x1xf32> to vector<128x128xf32>
    %21 = arith.addf %18, %20 : vector<128x128xf32>
    %22 = math.tanh %21 : vector<128x128xf32>
    %c0_17 = arith.constant 0 : index
    %c0_18 = arith.constant 0 : index
    %23 = vector.load %arg8[%c0_17, %c0_18] : memref<128x1xf32, #tpu.memory_space<vmem>>, vector<128x1xf32>
    %24 = vector.broadcast %23 : vector<128x1xf32> to vector<128x128xf32>
    %25 = arith.mulf %22, %24 : vector<128x128xf32>
    %c0_19 = arith.constant 0 : index
    %c0_20 = arith.constant 0 : index
    %26 = vector.load %arg9[%c0_19, %c0_20] : memref<128x128xf32, #tpu.memory_space<vmem>>, vector<128x128xf32>
    tpu.vector_store %arg9[%c0_19, %c0_20], %25 {strides = array<i32>} : memref<128x128xf32, #tpu.memory_space<vmem>>, vector<128x128xf32>,
    return
  }
  func.func @transform_0(%arg0: i32) -> (i32, i32) {
    %c0_i32 = arith.constant 0 : i32
    %c0_i32_0 = arith.constant 0 : i32
    return %c0_i32, %arg0 : i32, i32
  }
  func.func @transform_1(%arg0: i32) -> (i32, i32) {
    %c0_i32 = arith.constant 0 : i32
    %c0_i32_0 = arith.constant 0 : i32
    %c0_i32_1 = arith.constant 0 : i32
    return %c0_i32, %c0_i32_0 : i32, i32
  }
  func.func @transform_2(%arg0: i32) -> (i32, i32) {
    %c0_i32 = arith.constant 0 : i32
    %c0_i32_0 = arith.constant 0 : i32
    %c0_i32_1 = arith.constant 0 : i32
    return %c0_i32, %c0_i32_0 : i32, i32
  }
  func.func @transform_3(%arg0: i32) -> (i32, i32) {
    %c0_i32 = arith.constant 0 : i32
    %c0_i32_0 = arith.constant 0 : i32
    %c0_i32_1 = arith.constant 0 : i32
    return %c0_i32, %c0_i32_0 : i32, i32
  }
  func.func @transform_4(%arg0: i32) -> (i32, i32) {
    %c0_i32 = arith.constant 0 : i32
    %c0_i32_0 = arith.constant 0 : i32
    %c0_i32_1 = arith.constant 0 : i32
    return %c0_i32, %c0_i32_0 : i32, i32
  }
  func.func @transform_5(%arg0: i32) -> (i32, i32) {
    %c0_i32 = arith.constant 0 : i32
    %c0_i32_0 = arith.constant 0 : i32
    %c0_i32_1 = arith.constant 0 : i32
    return %c0_i32, %c0_i32_0 : i32, i32
  }
  func.func @transform_6(%arg0: i32) -> (i32, i32) {
    %c0_i32 = arith.constant 0 : i32
    %c0_i32_0 = arith.constant 0 : i32
    %c0_i32_1 = arith.constant 0 : i32
    return %c0_i32, %c0_i32_0 : i32, i32
  }
  func.func @transform_7(%arg0: i32) -> (i32, i32) {
    %c0_i32 = arith.constant 0 : i32
    %c0_i32_0 = arith.constant 0 : i32
    %c0_i32_1 = arith.constant 0 : i32
    return %c0_i32, %c0_i32_0 : i32, i32
  }
  func.func @transform_8(%arg0: i32) -> (i32, i32) {
    %c0_i32 = arith.constant 0 : i32
    %c0_i32_0 = arith.constant 0 : i32
    return %c0_i32, %arg0 : i32, i32
  }
}

module attributes {stable_mosaic.version = 11 : i64} {
  func.func @_mlp_proj_kernel(%arg0: i32, %arg1: memref<16x128xbf16, #tpu.memory_space<vmem>>, %arg2: memref<256x16xbf16, #tpu.memory_space<vmem>>, %arg3: memref<256x1xf32, #tpu.memory_space<vmem>>, %arg4: memref<256x256xbf16, #tpu.memory_space<vmem>>, %arg5: memref<256x1xf32, #tpu.memory_space<vmem>>, %arg6: memref<128x256xbf16, #tpu.memory_space<vmem>>, %arg7: memref<128x1xf32, #tpu.memory_space<vmem>>, %arg8: memref<128x1xf32, #tpu.memory_space<vmem>>, %arg9: memref<128x128xf32, #tpu.memory_space<vmem>>) attributes {dimension_semantics = [#tpu.dimension_semantics<parallel>], iteration_bounds = array<i64: 1>, scalar_prefetch = 0 : i64, scratch_operands = 0 : i64, tpu.core_type = #tpu.core_type<tc>, window_params = [{transform_indices = @transform_0, window_bounds = array<i64: 16, 128>}, {pipeline_mode = #tpu.pipeline_mode<synchronous>, transform_indices = @transform_1, window_bounds = array<i64: 256, 16>}, {pipeline_mode = #tpu.pipeline_mode<synchronous>, transform_indices = @transform_2, window_bounds = array<i64: 256, 1>}, {pipeline_mode = #tpu.pipeline_mode<synchronous>, transform_indices = @transform_3, window_bounds = array<i64: 256, 256>}, {pipeline_mode = #tpu.pipeline_mode<synchronous>, transform_indices = @transform_4, window_bounds = array<i64: 256, 1>}, {pipeline_mode = #tpu.pipeline_mode<synchronous>, transform_indices = @transform_5, window_bounds = array<i64: 128, 256>}, {pipeline_mode = #tpu.pipeline_mode<synchronous>, transform_indices = @transform_6, window_bounds = array<i64: 128, 1>}, {pipeline_mode = #tpu.pipeline_mode<synchronous>, transform_indices = @transform_7, window_bounds = array<i64: 128, 1>}, {transform_indices = @transform_8, window_bounds = array<i64: 128, 128>}]} {
    %c0 = arith.constant 0 : index
    %c0_0 = arith.constant 0 : index
    %0 = vector.load %arg1[%c0, %c0_0] : memref<16x128xbf16, #tpu.memory_space<vmem>>, vector<16x128xbf16>
    %c0_1 = arith.constant 0 : index
    %c0_2 = arith.constant 0 : index
    %1 = vector.load %arg2[%c0_1, %c0_2] : memref<256x16xbf16, #tpu.memory_space<vmem>>, vector<256x16xbf16>
    %cst = arith.constant dense<0.000000e+00> : vector<256x128xf32>
    %2 = tpu.matmul %1, %0, %cst {dimension_numbers = #tpu.dot_dimension_numbers<[1], [0], [0], [1], [0, 0, 1, 1], [], []>} : vector<256x16xbf16>, vector<16x128xbf16>, vector<256x128xf32> -> vector<256x128xf32>
    %c0_3 = arith.constant 0 : index
    %c0_4 = arith.constant 0 : index
    %3 = vector.load %arg3[%c0_3, %c0_4] : memref<256x1xf32, #tpu.memory_space<vmem>>, vector<256x1xf32>
    %4 = vector.broadcast %3 : vector<256x1xf32> to vector<256x128xf32>
    %5 = arith.addf %2, %4 : vector<256x128xf32>
    %cst_5 = arith.constant 0.000000e+00 : f32
    %6 = vector.broadcast %cst_5 : f32 to vector<256x128xf32>
    %7 = arith.maximumf %5, %6 : vector<256x128xf32>
    %8 = arith.truncf %7 : vector<256x128xf32> to vector<256x128xbf16>
    %c0_6 = arith.constant 0 : index
    %c0_7 = arith.constant 0 : index
    %9 = vector.load %arg4[%c0_6, %c0_7] : memref<256x256xbf16, #tpu.memory_space<vmem>>, vector<256x256xbf16>
    %cst_8 = arith.constant dense<0.000000e+00> : vector<256x128xf32>
    %10 = tpu.matmul %9, %8, %cst_8 {dimension_numbers = #tpu.dot_dimension_numbers<[1], [0], [0], [1], [0, 0, 1, 1], [], []>} : vector<256x256xbf16>, vector<256x128xbf16>, vector<256x128xf32> -> vector<256x128xf32>
    %c0_9 = arith.constant 0 : index
    %c0_10 = arith.constant 0 : index
    %11 = vector.load %arg5[%c0_9, %c0_10] : memref<256x1xf32, #tpu.memory_space<vmem>>, vector<256x1xf32>
    %12 = vector.broadcast %11 : vector<256x1xf32> to vector<256x128xf32>
    %13 = arith.addf %10, %12 : vector<256x128xf32>
    %cst_11 = arith.constant 0.000000e+00 : f32
    %14 = vector.broadcast %cst_11 : f32 to vector<256x128xf32>
    %15 = arith.maximumf %13, %14 : vector<256x128xf32>
    %16 = arith.truncf %15 : vector<256x128xf32> to vector<256x128xbf16>
    %c0_12 = arith.constant 0 : index
    %c0_13 = arith.constant 0 : index
    %17 = vector.load %arg6[%c0_12, %c0_13] : memref<128x256xbf16, #tpu.memory_space<vmem>>, vector<128x256xbf16>
    %cst_14 = arith.constant dense<0.000000e+00> : vector<128x128xf32>
    %18 = tpu.matmul %17, %16, %cst_14 {dimension_numbers = #tpu.dot_dimension_numbers<[1], [0], [0], [1], [0, 0, 1, 1], [], []>} : vector<128x256xbf16>, vector<256x128xbf16>, vector<128x128xf32> -> vector<128x128xf32>
    %c0_15 = arith.constant 0 : index
    %c0_16 = arith.constant 0 : index
    %19 = vector.load %arg7[%c0_15, %c0_16] : memref<128x1xf32, #tpu.memory_space<vmem>>, vector<128x1xf32>
    %20 = vector.broadcast %19 : vector<128x1xf32> to vector<128x128xf32>
    %21 = arith.addf %18, %20 : vector<128x128xf32>
    %22 = math.tanh %21 : vector<128x128xf32>
    %c0_17 = arith.constant 0 : index
    %c0_18 = arith.constant 0 : index
    %23 = vector.load %arg8[%c0_17, %c0_18] : memref<128x1xf32, #tpu.memory_space<vmem>>, vector<128x1xf32>
    %24 = vector.broadcast %23 : vector<128x1xf32> to vector<128x128xf32>
    %25 = arith.mulf %22, %24 : vector<128x128xf32>
    %c0_19 = arith.constant 0 : index
    %c0_20 = arith.constant 0 : index
    %26 = vector.load %arg9[%c0_19, %c0_20] : memref<128x128xf32, #tpu.memory_space<vmem>>, vector<128x128xf32>
    tpu.vector_store %arg9[%c0_19, %c0_20], %25 {strides = array<i32>} : memref<128x128xf32, #tpu.memory_space<vmem>>, vector<128x128xf32>,
    return
  }
  func.func @transform_0(%arg0: i32) -> (i32, i32) {
    %c0_i32 = arith.constant 0 : i32
    %c0_i32_0 = arith.constant 0 : i32
    return %c0_i32, %arg0 : i32, i32
  }
  func.func @transform_1(%arg0: i32) -> (i32, i32) {
    %c0_i32 = arith.constant 0 : i32
    %c0_i32_0 = arith.constant 0 : i32
    %c0_i32_1 = arith.constant 0 : i32
    return %c0_i32, %c0_i32_0 : i32, i32
  }
  func.func @transform_2(%arg0: i32) -> (i32, i32) {
    %c0_i32 = arith.constant 0 : i32
    %c0_i32_0 = arith.constant 0 : i32
    %c0_i32_1 = arith.constant 0 : i32
    return %c0_i32, %c0_i32_0 : i32, i32
  }
  func.func @transform_3(%arg0: i32) -> (i32, i32) {
    %c0_i32 = arith.constant 0 : i32
    %c0_i32_0 = arith.constant 0 : i32
    %c0_i32_1 = arith.constant 0 : i32
    return %c0_i32, %c0_i32_0 : i32, i32
  }
  func.func @transform_4(%arg0: i32) -> (i32, i32) {
    %c0_i32 = arith.constant 0 : i32
    %c0_i32_0 = arith.constant 0 : i32
    %c0_i32_1 = arith.constant 0 : i32
    return %c0_i32, %c0_i32_0 : i32, i32
  }
  func.func @transform_5(%arg0: i32) -> (i32, i32) {
    %c0_i32 = arith.constant 0 : i32
    %c0_i32_0 = arith.constant 0 : i32
    %c0_i32_1 = arith.constant 0 : i32
    return %c0_i32, %c0_i32_0 : i32, i32
  }
  func.func @transform_6(%arg0: i32) -> (i32, i32) {
    %c0_i32 = arith.constant 0 : i32
    %c0_i32_0 = arith.constant 0 : i32
    %c0_i32_1 = arith.constant 0 : i32
    return %c0_i32, %c0_i32_0 : i32, i32
  }
  func.func @transform_7(%arg0: i32) -> (i32, i32) {
    %c0_i32 = arith.constant 0 : i32
    %c0_i32_0 = arith.constant 0 : i32
    %c0_i32_1 = arith.constant 0 : i32
    return %c0_i32, %c0_i32_0 : i32, i32
  }
  func.func @transform_8(%arg0: i32) -> (i32, i32) {
    %c0_i32 = arith.constant 0 : i32
    %c0_i32_0 = arith.constant 0 : i32
    return %c0_i32, %arg0 : i32, i32
  }
}

</mosaic_0001>

<bundles_post_ra>
// kernel: tpu_custom_call.1
= control target key start
LH: loop header
LB: loop body
LE: loop exit
PB: predicated region body
PF: predicated region fallthrough
CT: control target
= control target key end

     0   :  { %v2102_v2 = vmov 0   ;;  %vm343_vm0 = vcmask 130048   ;;  %s2836_s0 = inlined_call_operand.vmem [shape: bf16[16,128], index: 0, kind: input, shape index: {}]   ;;  %s2837_s1 = inlined_call_operand.vmem [shape: bf16[256,16], index: 1, kind: input, shape index: {}]   ;;  %s2838_s2 = inlined_call_operand.vmem [shape: f32[256,1], index: 2, kind: input, shape index: {}]   ;;  %s2839_s3 = inlined_call_operand.vmem [shape: bf16[256,256], index: 3, kind: input, shape index: {}]   ;;  %s2840_s4 = inlined_call_operand.vmem [shape: f32[256,1], index: 4, kind: input, shape index: {}]   ;;  %s2841_s5 = inlined_call_operand.vmem [shape: bf16[128,256], index: 5, kind: input, shape index: {}]   ;;  %s2842_s6 = inlined_call_operand.vmem [shape: f32[128,1], index: 6, kind: input, shape index: {}]   ;;  %s2843_s7 = inlined_call_operand.vmem [shape: f32[128,1], index: 7, kind: input, shape index: {}]   ;;  %s2844_s8 = inlined_call_operand.hbm [shape: f32[128,128], index: 8, kind: output, shape index: {}]  }
   0x1   :  { %v81_v0 = vld [vmem:[%s2838_s2 + $0x80] sm:$0xff]  ;;  %1956 = vset.pattern.permute.xlu1 %v2102_v2  ;;  %1955 = vset.pattern.permute.xlu0 %v2102_v2  ;;  %v82_v4 = vld [vmem:[%s2838_s2 + $0x88] sm:$0xff]  ;;  %v1960_v8 = vld [vmem:[%s2837_s1 + $0x10] sm:$0xff]  }
   0x2   :  { %v65_v1 = vld [vmem:[%s2838_s2] sm:$0xff]  ;;  %179 = vperm.xlu0 %1955, %v81_v0   ;;  %v66_v5 = vld [vmem:[%s2838_s2 + $0x8] sm:$0xff]  ;;  %v83_v9 = vld [vmem:[%s2838_s2 + $0x90] sm:$0xff] }
   0x3   :  { %v1957_v3 = vld [vmem:[%s2836_s0] sm:$0xff]   ;;  %99 = vperm.xlu1 %1956, %v65_v1   ;;  %v1959_v7 = vld [vmem:[%s2837_s1 + $0x8] sm:$0xff]   ;;  %v84_v10 = vld [vmem:[%s2838_s2 + $0x98] sm:$0xff] }
   0x4   :  { %1917 = vmatprep.subr.bf16.mxu0 %v1957_v3  ;;  %v1958_v6 = vld [vmem:[%s2837_s1] sm:$0xff]   ;;  %v67_v11 = vld [vmem:[%s2838_s2 + $0x10] sm:$0xff]  ;;  %v68_v12 = vld [vmem:[%s2838_s2 + $0x18] sm:$0xff] }
   0x5   :  { %1918 = vmatpush3.bf16.msra.mxu0 %v1957_v3  ;;  %1919 = vmatprep.mubr.msk.bf16.mxu0 %vm343_vm0, %v1958_v6  ;;  %v1961_v13 = vld [vmem:[%s2837_s1 + $0x18] sm:$0xff]   ;;  %v1962_v14 = vld [vmem:[%s2837_s1 + $0x20] sm:$0xff]   ;;  %v86_v16 = vld [vmem:[%s2838_s2 + $0xa8] sm:$0xff] }
   0x6   :  { %184 = vperm.xlu0 %1955, %v82_v4   ;;  %v85_v15 = vld [vmem:[%s2838_s2 + $0xa0] sm:$0xff]  ;;  %v70_v18 = vld [vmem:[%s2838_s2 + $0x28] sm:$0xff]  ;;  %v1964_v20 = vld [vmem:[%s2837_s1 + $0x30] sm:$0xff]  }
   0x7   :  { %104 = vperm.xlu1 %1956, %v66_v5   ;;  %v69_v17 = vld [vmem:[%s2838_s2 + $0x20] sm:$0xff]  ;;  %v1963_v19 = vld [vmem:[%s2837_s1 + $0x28] sm:$0xff]   ;;  %v87_v21 = vld [vmem:[%s2838_s2 + $0xb0] sm:$0xff] }
   0x8   :  { %1920 = vmatmul.mubr.msk.bf16.vlgmr.msra.gmra.mrb[0].mxu0 %vm343_vm0, %v1959_v7  ;;  %v88_v22 = vld [vmem:[%s2838_s2 + $0xb8] sm:$0xff]  ;;  %v71_v23 = vld [vmem:[%s2838_s2 + $0x30] sm:$0xff]  ;;  %v1966_v26 = vld [vmem:[%s2837_s1 + $0x40] sm:$0xff]  }
   0x9   :  { %1923 = vmatprep.mubr.msk.bf16.mxu0 %vm343_vm0, %v1960_v8  ;;  %v72_v24 = vld [vmem:[%s2838_s2 + $0x38] sm:$0xff]  ;;  %v89_v27 = vld [vmem:[%s2838_s2 + $0xc0] sm:$0xff]  ;;  %v90_v28 = vld [vmem:[%s2838_s2 + $0xc8] sm:$0xff] }
   0xa   :  { %189 = vperm.xlu0 %1955, %v83_v9   ;;  %v1965_v25 = vld [vmem:[%s2837_s1 + $0x38] sm:$0xff]   ;;  %v73_v29 = vld [vmem:[%s2838_s2 + $0x40] sm:$0xff]  ;;  %v74_v30 = vld [vmem:[%s2838_s2 + $0x48] sm:$0xff] }
   0xb   :  { %194 = vperm.xlu1 %1956, %v84_v10   ;;  %v1967_v31 = vld [vmem:[%s2837_s1 + $0x48] sm:$0xff]   ;;  %v1968_v32 = vld [vmem:[%s2837_s1 + $0x50] sm:$0xff]   ;;  %v92_v34 = vld [vmem:[%s2838_s2 + $0xd8] sm:$0xff] }
   0xc   :  { %v91_v33 = vld [vmem:[%s2838_s2 + $0xd0] sm:$0xff]  ;;  %v76_v36 = vld [vmem:[%s2838_s2 + $0x58] sm:$0xff]  ;;  %v1970_v38 = vld [vmem:[%s2837_s1 + $0x60] sm:$0xff]  }
   0xd   :  { %v75_v35 = vld [vmem:[%s2838_s2 + $0x50] sm:$0xff]  ;;  %v1969_v37 = vld [vmem:[%s2837_s1 + $0x58] sm:$0xff]   ;;  %v93_v39 = vld [vmem:[%s2838_s2 + $0xe0] sm:$0xff] }
   0xe   :  { %109 = vperm.xlu0 %1955, %v67_v11   ;;  %v94_v40 = vld [vmem:[%s2838_s2 + $0xe8] sm:$0xff]  ;;  %v77_v41 = vld [vmem:[%s2838_s2 + $0x60] sm:$0xff]  ;;  %v1972_v44 = vld [vmem:[%s2837_s1 + $0x70] sm:$0xff]  }
   0xf   :  { %114 = vperm.xlu1 %1956, %v68_v12   ;;  %v78_v42 = vld [vmem:[%s2838_s2 + $0x68] sm:$0xff]  ;;  %v95_v45 = vld [vmem:[%s2838_s2 + $0xf0] sm:$0xff]  ;;  %v96_v46 = vld [vmem:[%s2838_s2 + $0xf8] sm:$0xff] }
  0x10   :  { %1924 = vmatmul.mubr.msk.bf16.gmra.mrb[4].mxu0 %vm343_vm0, %v1961_v13  ;;  %v1971_v43 = vld [vmem:[%s2837_s1 + $0x68] sm:$0xff]   ;;  %v79_v47 = vld [vmem:[%s2838_s2 + $0x70] sm:$0xff]  ;;  %v80_v48 = vld [vmem:[%s2838_s2 + $0x78] sm:$0xff] }
  0x11   :  { %1927 = vmatprep.mubr.msk.bf16.mxu0 %vm343_vm0, %v1962_v14  ;;  %v1973_v49 = vld [vmem:[%s2837_s1 + $0x78] sm:$0xff]   ;;  %v649_v50 = vld [vmem:[%s2840_s4 + $0x80] sm:$0xff]  ;;  %v650_v51 = vld [vmem:[%s2840_s4 + $0x88] sm:$0xff] }
  0x12   :  { %199 = vperm.xlu0 %1955, %v85_v15  }
  0x13   :  { %204 = vperm.xlu1 %1956, %v86_v16  }
  0x16   :  { %119 = vperm.xlu0 %1955, %v69_v17  }
  0x17   :  { %124 = vperm.xlu1 %1956, %v70_v18  }
  0x18   :  { %1928 = vmatmul.mubr.msk.bf16.gmra.mrb[8].mxu0 %vm343_vm0, %v1963_v19 }
  0x19   :  { %1931 = vmatprep.mubr.msk.bf16.mxu0 %vm343_vm0, %v1964_v20 }
  0x1a   :  { %209 = vperm.xlu0 %1955, %v87_v21  }
  0x1b   :  { %214 = vperm.xlu1 %1956, %v88_v22  }
  0x1e   :  { %129 = vperm.xlu0 %1955, %v71_v23  }
  0x1f   :  { %134 = vperm.xlu1 %1956, %v72_v24  }
  0x20   :  { %1932 = vmatmul.mubr.msk.bf16.gmra.mrb[12].mxu0 %vm343_vm0, %v1965_v25 }
  0x21   :  { %1935 = vmatprep.mubr.msk.bf16.mxu0 %vm343_vm0, %v1966_v26 }
  0x22   :  { %219 = vperm.xlu0 %1955, %v89_v27  }
  0x23   :  { %224 = vperm.xlu1 %1956, %v90_v28  }
  0x26   :  { %139 = vperm.xlu0 %1955, %v73_v29  }
  0x27   :  { %144 = vperm.xlu1 %1956, %v74_v30  }
  0x28   :  { %1936 = vmatmul.mubr.msk.bf16.gmra.mrb[16].mxu0 %vm343_vm0, %v1967_v31 }
  0x29   :  { %1939 = vmatprep.mubr.msk.bf16.mxu0 %vm343_vm0, %v1968_v32 }
  0x2a   :  { %229 = vperm.xlu0 %1955, %v91_v33  }
  0x2b   :  { %234 = vperm.xlu1 %1956, %v92_v34  }
  0x2e   :  { %149 = vperm.xlu0 %1955, %v75_v35  }
  0x2f   :  { %154 = vperm.xlu1 %1956, %v76_v36  }
  0x30   :  { %1940 = vmatmul.mubr.msk.bf16.gmra.mrb[20].mxu0 %vm343_vm0, %v1969_v37 }
  0x31   :  { %1943 = vmatprep.mubr.msk.bf16.mxu0 %vm343_vm0, %v1970_v38 }
  0x32   :  { %239 = vperm.xlu0 %1955, %v93_v39  }
  0x33   :  { %244 = vperm.xlu1 %1956, %v94_v40  }
  0x36   :  { %159 = vperm.xlu0 %1955, %v77_v41  }
  0x37   :  { %164 = vperm.xlu1 %1956, %v78_v42  }
  0x38   :  { %1944 = vmatmul.mubr.msk.bf16.gmra.mrb[24].mxu0 %vm343_vm0, %v1971_v43 }
  0x39   :  { %1947 = vmatprep.mubr.msk.bf16.mxu0 %vm343_vm0, %v1972_v44 }
  0x3a   :  { %249 = vperm.xlu0 %1955, %v95_v45  }
  0x3b   :  { %254 = vperm.xlu1 %1956, %v96_v46  }
  0x3e   :  { %169 = vperm.xlu0 %1955, %v79_v47  }
  0x3f   :  { %174 = vperm.xlu1 %1956, %v80_v48  }
  0x40   :  { %1948 = vmatmul.mubr.msk.bf16.gmra.mrb[28].mxu0 %vm343_vm0, %v1973_v49 }
  0x41   :  { %13 = vsyncpa [#allocation3], 0  ;;  %v633_v52 = vld [vmem:[%s2840_s4] sm:$0xff]  ;;  %v634_v53 = vld [vmem:[%s2840_s4 + $0x8] sm:$0xff] }
  0x42   :  { %747 = vperm.xlu0 %1955, %v649_v50   ;;  %v651_v54 = vld [vmem:[%s2840_s4 + $0x90] sm:$0xff]  ;;  %v652_v55 = vld [vmem:[%s2840_s4 + $0x98] sm:$0xff]  ;;  %v653_v58 = vld [vmem:[%s2840_s4 + $0xa0] sm:$0xff] }
  0x43   :  { %752 = vperm.xlu1 %1956, %v650_v51   ;;  %v635_v56 = vld [vmem:[%s2840_s4 + $0x10] sm:$0xff]  ;;  %v636_v57 = vld [vmem:[%s2840_s4 + $0x18] sm:$0xff]  ;;  %v654_v59 = vld [vmem:[%s2840_s4 + $0xa8] sm:$0xff] }
  0x44   :  { %v637_v60 = vld [vmem:[%s2840_s4 + $0x20] sm:$0xff]  ;;  %v638_v61 = vld [vmem:[%s2840_s4 + $0x28] sm:$0xff]  ;;  %v655_v62 = vld [vmem:[%s2840_s4 + $0xb0] sm:$0xff] }
  0x45   :  { %v656_v63 = vld [vmem:[%s2840_s4 + $0xb8] sm:$0xff]  ;;  %v639_v0 = vld [vmem:[%s2840_s4 + $0x30] sm:$0xff]  ;;  %v657_v2 = vld [vmem:[%s2840_s4 + $0xc0] sm:$0xff] }
  0x46   :  { %667 = vperm.xlu0 %1955, %v633_v52   ;;  %v640_v1 = vld [vmem:[%s2840_s4 + $0x38] sm:$0xff]  ;;  %v658_v3 = vld [vmem:[%s2840_s4 + $0xc8] sm:$0xff]  ;;  %v641_v4 = vld [vmem:[%s2840_s4 + $0x40] sm:$0xff] }
  0x47   :  { %672 = vperm.xlu1 %1956, %v634_v53   ;;  %v642_v5 = vld [vmem:[%s2840_s4 + $0x48] sm:$0xff]  ;;  %v659_v6 = vld [vmem:[%s2840_s4 + $0xd0] sm:$0xff]  ;;  %v660_v7 = vld [vmem:[%s2840_s4 + $0xd8] sm:$0xff] }
  0x48   :  { %v643_v8 = vld [vmem:[%s2840_s4 + $0x50] sm:$0xff]  ;;  %v644_v9 = vld [vmem:[%s2840_s4 + $0x58] sm:$0xff]  ;;  %v661_v10 = vld [vmem:[%s2840_s4 + $0xe0] sm:$0xff] }
  0x49   :  { %v662_v11 = vld [vmem:[%s2840_s4 + $0xe8] sm:$0xff]  ;;  %v645_v12 = vld [vmem:[%s2840_s4 + $0x60] sm:$0xff]  ;;  %v663_v14 = vld [vmem:[%s2840_s4 + $0xf0] sm:$0xff] }
  0x4a   :  { %757 = vperm.xlu0 %1955, %v651_v54   ;;  %v646_v13 = vld [vmem:[%s2840_s4 + $0x68] sm:$0xff]  ;;  %v664_v15 = vld [vmem:[%s2840_s4 + $0xf8] sm:$0xff]  ;;  %v647_v16 = vld [vmem:[%s2840_s4 + $0x70] sm:$0xff] }
  0x4b   :  { %762 = vperm.xlu1 %1956, %v652_v55   ;;  %v648_v17 = vld [vmem:[%s2840_s4 + $0x78] sm:$0xff]  ;;  %v1210_v18 = vld [vmem:[%s2842_s6] sm:$0xff]  ;;  %v1211_v19 = vld [vmem:[%s2842_s6 + $0x8] sm:$0xff] }
  0x4c   :  { %v1212_v20 = vld [vmem:[%s2842_s6 + $0x10] sm:$0xff]  ;;  %v1213_v21 = vld [vmem:[%s2842_s6 + $0x18] sm:$0xff]  ;;  %v1214_v22 = vld [vmem:[%s2842_s6 + $0x20] sm:$0xff] }
  0x4d   :  { %v1215_v23 = vld [vmem:[%s2842_s6 + $0x28] sm:$0xff]  ;;  %v1216_v24 = vld [vmem:[%s2842_s6 + $0x30] sm:$0xff]  ;;  %v1217_v25 = vld [vmem:[%s2842_s6 + $0x38] sm:$0xff] }
  0x4e   :  { %677 = vperm.xlu0 %1955, %v635_v56   ;;  %v1218_v26 = vld [vmem:[%s2842_s6 + $0x40] sm:$0xff]  ;;  %v1219_v27 = vld [vmem:[%s2842_s6 + $0x48] sm:$0xff]  ;;  %v1220_v28 = vld [vmem:[%s2842_s6 + $0x50] sm:$0xff] }
  0x4f   :  { %682 = vperm.xlu1 %1956, %v636_v57   ;;  %v1221_v29 = vld [vmem:[%s2842_s6 + $0x58] sm:$0xff]  ;;  %v1222_v30 = vld [vmem:[%s2842_s6 + $0x60] sm:$0xff]  ;;  %v1223_v31 = vld [vmem:[%s2842_s6 + $0x68] sm:$0xff] }
  0x50   :  { %v1224_v34 = vld [vmem:[%s2842_s6 + $0x70] sm:$0xff]  ;;  %v1225_v35 = vld [vmem:[%s2842_s6 + $0x78] sm:$0xff]  ;;  %v1499_v37 = vld [vmem:[%s2843_s7] sm:$0xff] }
  0x51   :  { %v1500_v38 = vld [vmem:[%s2843_s7 + $0x8] sm:$0xff]  ;;  %v1501_v41 = vld [vmem:[%s2843_s7 + $0x10] sm:$0xff]  ;;  %v1502_v42 = vld [vmem:[%s2843_s7 + $0x18] sm:$0xff] }
  0x52   :  { %767 = vperm.xlu0 %1955, %v653_v58   ;;  %v1976_v40 = vld [vmem:[%s2839_s3 + $0x4] ss:$8 sps:$4 sm:$0xff]   ;;  %v1505_v48 = vld [vmem:[%s2843_s7 + $0x30] sm:$0xff]  ;;  %v1506_v49 = vld [vmem:[%s2843_s7 + $0x38] sm:$0xff] }
  0x53   :  { %772 = vperm.xlu1 %1956, %v654_v59   ;;  %1017 = vmatprep.mubr.bf16.mxu1 %v1976_v40  ;;  %v1503_v45 = vld [vmem:[%s2843_s7 + $0x20] sm:$0xff]  ;;  %v1504_v46 = vld [vmem:[%s2843_s7 + $0x28] sm:$0xff]  ;;  %v1509_v55 = vld [vmem:[%s2843_s7 + $0x50] sm:$0xff] }
  0x54   :  { %v1507_v51 = vld [vmem:[%s2843_s7 + $0x40] sm:$0xff]  ;;  %v1508_v52 = vld [vmem:[%s2843_s7 + $0x48] sm:$0xff]  ;;  %v1510_v56 = vld [vmem:[%s2843_s7 + $0x58] sm:$0xff] }
  0x55   :  { %v1511_v58 = vld [vmem:[%s2843_s7 + $0x60] sm:$0xff]  ;;  %v1512_v59 = vld [vmem:[%s2843_s7 + $0x68] sm:$0xff] }
  0x56   :  { %687 = vperm.xlu0 %1955, %v637_v60  }
  0x57   :  { %692 = vperm.xlu1 %1956, %v638_v61   ;;  %v1513_v61 = vld [vmem:[%s2843_s7 + $0x70] sm:$0xff] }
  0x5a   :  { %777 = vperm.xlu0 %1955, %v655_v62   ;;  %v1514_v62 = vld [vmem:[%s2843_s7 + $0x78] sm:$0xff] }
  0x5b   :  { %782 = vperm.xlu1 %1956, %v656_v63  }
  0x5e   :  { %697 = vperm.xlu0 %1955, %v639_v0  }
  0x5f   :  { %702 = vperm.xlu1 %1956, %v640_v1  }
  0x62   :  { %787 = vperm.xlu0 %1955, %v657_v2  }
  0x63   :  { %792 = vperm.xlu1 %1956, %v658_v3  }
  0x66   :  { %707 = vperm.xlu0 %1955, %v641_v4  }
  0x67   :  { %712 = vperm.xlu1 %1956, %v642_v5  }
  0x6a   :  { %797 = vperm.xlu0 %1955, %v659_v6  }
  0x6b   :  { %802 = vperm.xlu1 %1956, %v660_v7  }
  0x6e   :  { %717 = vperm.xlu0 %1955, %v643_v8  }
  0x6f   :  { %722 = vperm.xlu1 %1956, %v644_v9  }
  0x72   :  { %807 = vperm.xlu0 %1955, %v661_v10  }
  0x73   :  { %812 = vperm.xlu1 %1956, %v662_v11  }
  0x76   :  { %727 = vperm.xlu0 %1955, %v645_v12  }
  0x77   :  { %732 = vperm.xlu1 %1956, %v646_v13  }
  0x7a   :  { %817 = vperm.xlu0 %1955, %v663_v14  }
  0x7b   :  { %822 = vperm.xlu1 %1956, %v664_v15  }
  0x7e   :  { %737 = vperm.xlu0 %1955, %v647_v16  }
  0x7f   :  { %742 = vperm.xlu1 %1956, %v648_v17  }
  0x81   :  { %v2452_v32 = vpop.permute.xlu0 %179 }
  0x82   :  { %1228 = vperm.xlu0 %1955, %v1210_v18   ;;  %v2454_v33 = vpop.permute.xlu1 %99 }
  0x83   :  { %1233 = vperm.xlu1 %1956, %v1211_v19  }
  0x85   :  { %v2462_v36 = vpop.permute.xlu0 %184 }
  0x86   :  { %1238 = vperm.xlu0 %1955, %v1212_v20   ;;  %v105_v39 = vpop.permute.xlu1 %104 }
  0x87   :  { %1243 = vperm.xlu1 %1956, %v1213_v21  }
  0x89   :  { %v2479_v43 = vpop.permute.xlu0 %189 }
  0x8a   :  { %1248 = vperm.xlu0 %1955, %v1214_v22   ;;  %v2481_v44 = vpop.permute.xlu1 %194 }
  0x8b   :  { %1253 = vperm.xlu1 %1956, %v1215_v23  }
  0x8d   :  { %v110_v47 = vpop.permute.xlu0 %109 }
  0x8e   :  { %1258 = vperm.xlu0 %1955, %v1216_v24   ;;  %v115_v50 = vpop.permute.xlu1 %114 }
  0x8f   :  { %1263 = vperm.xlu1 %1956, %v1217_v25  }
  0x91   :  { %v2501_v53 = vpop.permute.xlu0 %199 }
  0x92   :  { %1268 = vperm.xlu0 %1955, %v1218_v26   ;;  %v2503_v54 = vpop.permute.xlu1 %204 }
  0x93   :  { %1273 = vperm.xlu1 %1956, %v1219_v27  }
  0x95   :  { %v120_v57 = vpop.permute.xlu0 %119 }
  0x96   :  { %1278 = vperm.xlu0 %1955, %v1220_v28   ;;  %v125_v60 = vpop.permute.xlu1 %124 }
  0x97   :  { %1283 = vperm.xlu1 %1956, %v1221_v29  }
  0x99   :  { %v2523_v63 = vpop.permute.xlu0 %209 }
  0x9a   :  { %1288 = vperm.xlu0 %1955, %v1222_v30   ;;  %v2525_v0 = vpop.permute.xlu1 %214 }
  0x9b   :  { %1293 = vperm.xlu1 %1956, %v1223_v31  }
  0x9d   :  { %v130_v1 = vpop.permute.xlu0 %129 }
  0x9e   :  { %1298 = vperm.xlu0 %1955, %v1224_v34   ;;  %v135_v2 = vpop.permute.xlu1 %134 }
  0x9f   :  { %1303 = vperm.xlu1 %1956, %v1225_v35  }
  0xa1   :  { %v2527_v3 = vpop.permute.xlu0 %219 }
  0xa2   :  { %1517 = vperm.xlu0 %1955, %v1499_v37   ;;  %v2529_v4 = vpop.permute.xlu1 %224 }
  0xa3   :  { %1522 = vperm.xlu1 %1956, %v1500_v38  }
  0xa5   :  { %v140_v5 = vpop.permute.xlu0 %139 }
  0xa6   :  { %1527 = vperm.xlu0 %1955, %v1501_v41   ;;  %v145_v6 = vpop.permute.xlu1 %144 }
  0xa7   :  { %1532 = vperm.xlu1 %1956, %v1502_v42  }
  0xa9   :  { %v2531_v7 = vpop.permute.xlu0 %229 }
  0xaa   :  { %1537 = vperm.xlu0 %1955, %v1503_v45   ;;  %v2533_v8 = vpop.permute.xlu1 %234 }
  0xab   :  { %1542 = vperm.xlu1 %1956, %v1504_v46  }
  0xad   :  { %v150_v9 = vpop.permute.xlu0 %149 }
  0xae   :  { %1547 = vperm.xlu0 %1955, %v1505_v48   ;;  %v155_v13 = vpop.permute.xlu1 %154 }
  0xaf   :  { %1552 = vperm.xlu1 %1956, %v1506_v49  }
  0xb1   :  { %v2536_v21 = vpop.permute.xlu0 %239 }
  0xb2   :  { %1557 = vperm.xlu0 %1955, %v1507_v51   ;;  %v2540_v25 = vpop.permute.xlu1 %244 }
  0xb3   :  { %1562 = vperm.xlu1 %1956, %v1508_v52  }
  0xb5   :  { %v160_v34 = vpop.permute.xlu0 %159 }
  0xb6   :  { %1567 = vperm.xlu0 %1955, %v1509_v55   ;;  %v165_v40 = vpop.permute.xlu1 %164 }
  0xb7   :  { %1572 = vperm.xlu1 %1956, %v1510_v56  }
  0xba   :  { %1577 = vperm.xlu0 %1955, %v1511_v58   ;;  %v2550_v56 = vpop.permute.xlu1 %254 }
  0xbb   :  { %1582 = vperm.xlu1 %1956, %v1512_v59  }
  0xbe   :  { %1587 = vperm.xlu0 %1955, %v1513_v61  }
  0xbf   :  { %1592 = vperm.xlu1 %1956, %v1514_v62  }
  0xdb   :  { %v1921_v10 = vpop.f32.mrb[0].mxu0 }
  0xdc   :  { %v435_v11 = vadd.f32 %v1921_v10, %v110_v47  ;;  %v426_v12 = vpop.f32.mrb[1].mxu0 }
  0xdd   :  { %v1922_v14 = vpop.f32.mrb[2].mxu0  ;;  %v427_v15 = vadd.f32 %v426_v12, %v2454_v33 }
  0xde   :  { %v438_v16 = vadd.f32 %v1922_v14, %v115_v50  ;;  %v429_v17 = vpop.f32.mrb[3].mxu0  ;;  %v555_v18 = vmax.f32 %v435_v11, 0.0  ;;  %v2548_v50 = vpop.permute.xlu0 %249 }
  0xdf   :  { %v430_v20 = vadd.f32 %v429_v17, %v105_v39  ;;  %v553_v22 = vmax.f32 %v427_v15, 0.0  ;;  %v175_v14 = vpop.permute.xlu1 %174 }
  0xe0   :  { %v556_v19 = vmax.f32 %v438_v16, 0.0 }
  0xe1   :  { %v554_v24 = vmax.f32 %v430_v20, 0.0 }
  0xe2   :  { %v2538_v23 = vpack.c.bf16 %v556_v19, %v555_v18 }
  0xe3   :  { %v1925_v26 = vpop.f32.mrb[4].mxu0  ;;  %v2542_v29 = vpack.c.bf16 %v554_v24, %v553_v22 }
  0xe4   :  { %v451_v27 = vadd.f32 %v1925_v26, %v130_v1  ;;  %v442_v28 = vpop.f32.mrb[5].mxu0 }
  0xe5   :  { %v1926_v30 = vpop.f32.mrb[6].mxu0  ;;  %v443_v31 = vadd.f32 %v442_v28, %v120_v57 }
  0xe6   :  { %v454_v33 = vadd.f32 %v1926_v30, %v135_v2  ;;  %v445_v35 = vpop.f32.mrb[7].mxu0  ;;  %v559_v37 = vmax.f32 %v451_v27, 0.0  ;;  %v170_v2 = vpop.permute.xlu0 %169 }
  0xe7   :  { %v446_v39 = vadd.f32 %v445_v35, %v125_v60  ;;  %v557_v41 = vmax.f32 %v443_v31, 0.0 }
  0xe8   :  { %v560_v38 = vmax.f32 %v454_v33, 0.0 }
  0xe9   :  { %v558_v45 = vmax.f32 %v446_v39, 0.0 }
  0xea   :  { %v2544_v42 = vpack.c.bf16 %v560_v38, %v559_v37 }
  0xeb   :  { %v1929_v46 = vpop.f32.mrb[8].mxu0  ;;  %v2546_v47 = vpack.c.bf16 %v558_v45, %v557_v41 }
  0xec   :  { %v467_v48 = vadd.f32 %v1929_v46, %v150_v9  ;;  %v458_v49 = vpop.f32.mrb[9].mxu0 }
  0xed   :  { %v1930_v51 = vpop.f32.mrb[10].mxu0  ;;  %v459_v52 = vadd.f32 %v458_v49, %v140_v5 }
  0xee   :  { %v470_v55 = vadd.f32 %v1930_v51, %v155_v13  ;;  %v461_v57 = vpop.f32.mrb[11].mxu0  ;;  %v563_v58 = vmax.f32 %v467_v48, 0.0 }
  0xef   :  { %v462_v60 = vadd.f32 %v461_v57, %v145_v6  ;;  %v561_v61 = vmax.f32 %v459_v52, 0.0 }
  0xf0   :  { %v564_v59 = vmax.f32 %v470_v55, 0.0 }
  0xf1   :  { %v562_v1 = vmax.f32 %v462_v60, 0.0 }
  0xf2   :  { %v2552_v62 = vpack.c.bf16 %v564_v59, %v563_v58 }
  0xf3   :  { %v1933_v10 = vpop.f32.mrb[12].mxu0  ;;  %v2554_v11 = vpack.c.bf16 %v562_v1, %v561_v61 }
  0xf4   :  { %v483_v9 = vadd.f32 %v1933_v10, %v170_v2  ;;  %v474_v12 = vpop.f32.mrb[13].mxu0 }
  0xf5   :  { %v1934_v15 = vpop.f32.mrb[14].mxu0  ;;  %v475_v5 = vadd.f32 %v474_v12, %v160_v34 }
  0xf6   :  { %v486_v13 = vadd.f32 %v1934_v15, %v175_v14  ;;  %v477_v16 = vpop.f32.mrb[15].mxu0  ;;  %v567_v17 = vmax.f32 %v483_v9, 0.0 }
  0xf7   :  { %v478_v19 = vadd.f32 %v477_v16, %v165_v40  ;;  %v565_v20 = vmax.f32 %v475_v5, 0.0 }
  0xf8   :  { %v568_v18 = vmax.f32 %v486_v13, 0.0 }
  0xf9   :  { %v566_v22 = vmax.f32 %v478_v19, 0.0 }
  0xfa   :  { %v2556_v6 = vpack.c.bf16 %v568_v18, %v567_v17 }
  0xfb   :  { %v1937_v24 = vpop.f32.mrb[16].mxu0  ;;  %v2558_v26 = vpack.c.bf16 %v566_v22, %v565_v20  ;;  %v1985_v22 = vld [vmem:[%s2839_s3 + $0x30] ss:$8 sps:$4 sm:$0xff]  }
  0xfc   :  { %v499_v27 = vadd.f32 %v1937_v24, %v2479_v43  ;;  %v490_v28 = vpop.f32.mrb[17].mxu0  ;;  %v1986_v24 = vld [vmem:[%s2839_s3 + $0x44] ss:$8 sps:$4 sm:$0xff]  }
  0xfd   :  { %v1938_v30 = vpop.f32.mrb[18].mxu0  ;;  %v491_v31 = vadd.f32 %v490_v28, %v2452_v32  ;;  %v1991_v28 = vld [vmem:[%s2839_s3 + $0x50] ss:$8 sps:$4 sm:$0xff]  }
  0xfe   :  { %v502_v33 = vadd.f32 %v1938_v30, %v2481_v44  ;;  %v493_v34 = vpop.f32.mrb[19].mxu0  ;;  %v571_v35 = vmax.f32 %v499_v27, 0.0  ;;  %v1989_v27 = vld [vmem:[%s2839_s3 + $0x54] ss:$8 sps:$4 sm:$0xff]   ;;  %v1992_v30 = vld [vmem:[%s2839_s3 + $0x64] ss:$8 sps:$4 sm:$0xff]  }
  0xff   :  { %v494_v38 = vadd.f32 %v493_v34, %v2462_v36  ;;  %v569_v39 = vmax.f32 %v491_v31, 0.0  ;;  %v1994_v31 = vld [vmem:[%s2839_s3 + $0x60] ss:$8 sps:$4 sm:$0xff]   ;;  %v1997_v34 = vld [vmem:[%s2839_s3 + $0x70] ss:$8 sps:$4 sm:$0xff]  }
 0x100   :  { %v572_v37 = vmax.f32 %v502_v33, 0.0  ;;  %v1995_v33 = vld [vmem:[%s2839_s3 + $0x74] ss:$8 sps:$4 sm:$0xff]  }
 0x101   :  { %v570_v41 = vmax.f32 %v494_v38, 0.0  ;;  %v2001_v38 = vld [vmem:[%s2839_s3 + $0x94] ss:$8 sps:$4 sm:$0xff]  }
 0x102   :  { %v594_v40 = vpack.c.bf16 %v572_v37, %v571_v35  ;;  %v1998_v35 = vld [vmem:[%s2839_s3 + $0x84] ss:$8 sps:$4 sm:$0xff]   ;;  %v2000_v37 = vld [vmem:[%s2839_s3 + $0x80] ss:$8 sps:$4 sm:$0xff]  }
 0x103   :  { %v1941_v45 = vpop.f32.mrb[20].mxu0  ;;  %v593_v49 = vpack.c.bf16 %v570_v41, %v569_v39  ;;  %v2003_v39 = vld [vmem:[%s2839_s3 + $0x90] ss:$8 sps:$4 sm:$0xff]   ;;  %v2006_v41 = vld [vmem:[%s2839_s3 + $0xa0] ss:$8 sps:$4 sm:$0xff]  }
 0x104   :  { %v515_v46 = vadd.f32 %v1941_v45, %v2523_v63  ;;  %v506_v48 = vpop.f32.mrb[21].mxu0  ;;  %v2007_v45 = vld [vmem:[%s2839_s3 + $0xb4] ss:$8 sps:$4 sm:$0xff]  }
 0x105   :  { %v1942_v43 = vpop.f32.mrb[22].mxu0  ;;  %v507_v51 = vadd.f32 %v506_v48, %v2501_v53  ;;  %1741 = vmatprep.subr.bf16.mxu1 %v593_v49  ;;  %v2010_v48 = vld [vmem:[%s2839_s3 + $0xc4] ss:$8 sps:$4 sm:$0xff]   ;;  %v2012_v49 = vld [vmem:[%s2839_s3 + $0xc0] ss:$8 sps:$4 sm:$0xff]  }
 0x106   :  { %v518_v32 = vadd.f32 %v1942_v43, %v2525_v0  ;;  %v509_v44 = vpop.f32.mrb[23].mxu0  ;;  %1742 = vmatpush3.bf16.msra.mxu1 %v2542_v29  ;;  %v575_v52 = vmax.f32 %v515_v46, 0.0  ;;  %v2009_v46 = vld [vmem:[%s2839_s3 + $0xb0] ss:$8 sps:$4 sm:$0xff]   ;;  %v2013_v43 = vld [vmem:[%s2839_s3 + $0xd4] ss:$8 sps:$4 sm:$0xff]  }
 0x107   :  { %v510_v36 = vadd.f32 %v509_v44, %v2503_v54  ;;  %1743 = vmatprep.subr.bf16.mxu1 %v594_v40  ;;  %v573_v57 = vmax.f32 %v507_v51, 0.0  ;;  %v2004_v40 = vld [vmem:[%s2839_s3 + $0xa4] ss:$8 sps:$4 sm:$0xff]   ;;  %v2015_v51 = vld [vmem:[%s2839_s3 + $0xd0] ss:$8 sps:$4 sm:$0xff]  }
 0x108   :  { %v576_v55 = vmax.f32 %v518_v32, 0.0  ;;  %v2016_v32 = vld [vmem:[%s2839_s3 + $0xe4] ss:$8 sps:$4 sm:$0xff]   ;;  %v2018_v44 = vld [vmem:[%s2839_s3 + $0xe0] ss:$8 sps:$4 sm:$0xff]  }
 0x109   :  { %v574_v59 = vmax.f32 %v510_v36, 0.0  ;;  %v2677_v36 = vpop.permute.xlu0 %747 }
 0x10a   :  { %v596_v58 = vpack.c.bf16 %v576_v55, %v575_v52  ;;  %1744 = vmatpush3.bf16.msra.mxu1 %v2538_v23  ;;  %v2019_v52 = vld [vmem:[%s2839_s3 + $0xf4] ss:$8 sps:$4 sm:$0xff]   ;;  %v2021_v55 = vld [vmem:[%s2839_s3 + $0xf0] ss:$8 sps:$4 sm:$0xff]  }
 0x10b   :  { %v1945_v63 = vpop.f32.mrb[24].mxu0  ;;  %v595_v60 = vpack.c.bf16 %v574_v59, %v573_v57  ;;  %v2679_v57 = vpop.permute.xlu1 %752 }
 0x10c   :  { %v531_v53 = vadd.f32 %v1945_v63, %v2531_v7  ;;  %v522_v61 = vpop.f32.mrb[25].mxu0 }
 0x10d   :  { %v1946_v0 = vpop.f32.mrb[26].mxu0  ;;  %v523_v1 = vadd.f32 %v522_v61, %v2527_v3  ;;  %1745 = vmatprep.subr.bf16.mxu1 %v595_v60 }
 0x10e   :  { %v534_v29 = vadd.f32 %v1946_v0, %v2533_v8  ;;  %v525_v2 = vpop.f32.mrb[27].mxu0  ;;  %1746 = vmatpush3.bf16.msra.mxu1 %v2546_v47  ;;  %v579_v54 = vmax.f32 %v531_v53, 0.0 }
 0x10f   :  { %v526_v9 = vadd.f32 %v525_v2, %v2529_v4  ;;  %1747 = vmatprep.subr.bf16.mxu1 %v596_v58  ;;  %v577_v23 = vmax.f32 %v523_v1, 0.0  ;;  %v668_v58 = vpop.permute.xlu0 %667  ;;  %v673_v59 = vpop.permute.xlu1 %672 }
 0x110   :  { %v580_v10 = vmax.f32 %v534_v29, 0.0 }
 0x111   :  { %v578_v14 = vmax.f32 %v526_v9, 0.0 }
 0x112   :  { %v598_v12 = vpack.c.bf16 %v580_v10, %v579_v54  ;;  %1748 = vmatpush3.bf16.msra.mxu1 %v2544_v42 }
 0x113   :  { %v1949_v7 = vpop.f32.mrb[28].mxu0  ;;  %v597_v15 = vpack.c.bf16 %v578_v14, %v577_v23  ;;  %v2681_v63 = vpop.permute.xlu0 %757 }
 0x114   :  { %v547_v3 = vadd.f32 %v1949_v7, %v2548_v50  ;;  %v538_v5 = vpop.f32.mrb[29].mxu0  ;;  %v2683_v60 = vpop.permute.xlu1 %762 }
 0x115   :  { %v1950_v8 = vpop.f32.mrb[30].mxu0  ;;  %v539_v13 = vadd.f32 %v538_v5, %v2536_v21  ;;  %1749 = vmatprep.subr.bf16.mxu1 %v597_v15  ;;  %v1974_v21 = vld [vmem:[%s2839_s3] ss:$8 sps:$4 sm:$0xff]  }
 0x116   :  { %v550_v47 = vadd.f32 %v1950_v8, %v2550_v56  ;;  %v541_v16 = vpop.f32.mrb[31].mxu0  ;;  %1750 = vmatpush3.bf16.msra.mxu1 %v2554_v11  ;;  %v583_v4 = vmax.f32 %v547_v3, 0.0  ;;  %v1979_v56 = vld [vmem:[%s2839_s3 + $0x10] ss:$8 sps:$4 sm:$0xff]   ;;  %v1982_v11 = vld [vmem:[%s2839_s3 + $0x20] ss:$8 sps:$4 sm:$0xff]  }
 0x117   :  { %v542_v18 = vadd.f32 %v541_v16, %v2540_v25  ;;  %1751 = vmatprep.subr.bf16.mxu1 %v598_v12  ;;  %v581_v42 = vmax.f32 %v539_v13, 0.0  ;;  %v1977_v25 = vld [vmem:[%s2839_s3 + $0x14] ss:$8 sps:$4 sm:$0xff]   ;;  %v678_v53 = vpop.permute.xlu0 %677  ;;  %v2024_v3 = vld [vmem:[%s2841_s5 + $0x4] ss:$8 sps:$4 sm:$0xff]  }
 0x118   :  { %v584_v17 = vmax.f32 %v550_v47, 0.0  ;;  %v683_v61 = vpop.permute.xlu1 %682  ;;  %1418 = vmatprep.mubr.bf16.mxu0 %v2024_v3 }
 0x119   :  { %v582_v20 = vmax.f32 %v542_v18, 0.0 }
 0x11a   :  { %v600_v19 = vpack.c.bf16 %v584_v17, %v583_v4  ;;  %1752 = vmatpush3.bf16.msra.mxu1 %v2552_v62  ;;  %v1980_v62 = vld [vmem:[%s2839_s3 + $0x24] ss:$8 sps:$4 sm:$0xff]  }
 0x11b   :  { %v599_v50 = vpack.c.bf16 %v582_v20, %v581_v42  ;;  %v2685_v0 = vpop.permute.xlu0 %767 }
 0x11c   :  { %v2687_v1 = vpop.permute.xlu1 %772 }
 0x11d   :  { %1753 = vmatprep.subr.bf16.mxu1 %v599_v50 }
 0x11e   :  { %1754 = vmatpush3.bf16.msra.mxu1 %v2558_v26  ;;  %v1988_v26 = vld [vmem:[%s2839_s3 + $0x40] ss:$8 sps:$4 sm:$0xff]  }
 0x11f   :  { %1755 = vmatprep.subr.bf16.mxu1 %v600_v19  ;;  %v688_v29 = vpop.permute.xlu0 %687 }
 0x120   :  { %v693_v54 = vpop.permute.xlu1 %692 }
 0x122   :  { %1756 = vmatpush3.bf16.msra.mxu1 %v2556_v6  ;;  %v1983_v6 = vld [vmem:[%s2839_s3 + $0x34] ss:$8 sps:$4 sm:$0xff]  }
 0x123   :  { %v2689_v15 = vpop.permute.xlu0 %777 }
 0x124   :  { %v2694_v8 = vpop.permute.xlu1 %782 }
 0x125   :  { %1018 = vmatmul.mubr.bf16.vlgmr.msra.gmra.mrb[0].mxu1 %v1974_v21 }
 0x126   :  { %1025 = vmatprep.mubr.bf16.mxu1 %v1977_v25 }
 0x127   :  { %v698_v19 = vpop.permute.xlu0 %697 }
 0x128   :  { %v703_v25 = vpop.permute.xlu1 %702 }
 0x12d   :  { %1026 = vmatmul.mubr.bf16.gmra.mrb[4].mxu1 %v1979_v56 }
 0x12e   :  { %1033 = vmatprep.mubr.bf16.mxu1 %v1980_v62 }
 0x135   :  { %1034 = vmatmul.mubr.bf16.gmra.mrb[8].mxu1 %v1982_v11 }
 0x136   :  { %1041 = vmatprep.mubr.bf16.mxu1 %v1983_v6 }
 0x13d   :  { %1042 = vmatmul.mubr.bf16.gmra.mrb[12].mxu1 %v1985_v22  ;;  %v2698_v22 = vpop.permute.xlu0 %787 }
 0x13e   :  { %1049 = vmatprep.mubr.bf16.mxu1 %v1986_v24 }
 0x145   :  { %1050 = vmatmul.mubr.bf16.gmra.mrb[16].mxu1 %v1988_v26 }
 0x146   :  { %1057 = vmatprep.mubr.bf16.mxu1 %v1989_v27 }
 0x14d   :  { %1058 = vmatmul.mubr.bf16.gmra.mrb[20].mxu1 %v1991_v28 }
 0x14e   :  { %1065 = vmatprep.mubr.bf16.mxu1 %v1992_v30  ;;  %v2702_v30 = vpop.permute.xlu1 %792 }
 0x155   :  { %1066 = vmatmul.mubr.bf16.gmra.mrb[24].mxu1 %v1994_v31 }
 0x156   :  { %1073 = vmatprep.mubr.bf16.mxu1 %v1995_v33 }
 0x15d   :  { %1074 = vmatmul.mubr.bf16.gmra.mrb[28].mxu1 %v1997_v34 }
 0x15e   :  { %1081 = vmatprep.mubr.bf16.mxu1 %v1998_v35 }
 0x165   :  { %1082 = vmatmul.mubr.bf16.gmra.mrb[32].mxu1 %v2000_v37  ;;  %v708_v37 = vpop.permute.xlu0 %707 }
 0x166   :  { %1089 = vmatprep.mubr.bf16.mxu1 %v2001_v38 }
 0x16d   :  { %1090 = vmatmul.mubr.bf16.gmra.mrb[36].mxu1 %v2003_v39 }
 0x16e   :  { %1097 = vmatprep.mubr.bf16.mxu1 %v2004_v40 }
 0x175   :  { %1098 = vmatmul.mubr.bf16.gmra.mrb[40].mxu1 %v2006_v41  ;;  %v713_v41 = vpop.permute.xlu1 %712 }
 0x176   :  { %1105 = vmatprep.mubr.bf16.mxu1 %v2007_v45 }
 0x17d   :  { %1106 = vmatmul.mubr.bf16.gmra.mrb[44].mxu1 %v2009_v46 }
 0x17e   :  { %1113 = vmatprep.mubr.bf16.mxu1 %v2010_v48 }
 0x185   :  { %1114 = vmatmul.mubr.bf16.gmra.mrb[48].mxu1 %v2012_v49 }
 0x186   :  { %1121 = vmatprep.mubr.bf16.mxu1 %v2013_v43 }
 0x18d   :  { %1122 = vmatmul.mubr.bf16.gmra.mrb[52].mxu1 %v2015_v51 }
 0x18e   :  { %1129 = vmatprep.mubr.bf16.mxu1 %v2016_v32 }
 0x195   :  { %1130 = vmatmul.mubr.bf16.gmra.mrb[56].mxu1 %v2018_v44  ;;  %v2706_v44 = vpop.permute.xlu0 %797 }
 0x196   :  { %1137 = vmatprep.mubr.bf16.mxu1 %v2019_v52 }
 0x19d   :  { %1138 = vmatmul.mubr.bf16.gmra.mrb[60].mxu1 %v2021_v55  ;;  %v2708_v55 = vpop.permute.xlu1 %802 }
 0x1f8   :  { %v1757_v2 = vpop.f32.mrb[0].mxu1 }
 0x1f9   :  { %v1758_v10 = vpop.f32.mrb[1].mxu1 }
 0x1fa   :  { %v1759_v9 = vadd.f32 %v1758_v10, %v1757_v2  ;;  %v1760_v23 = vpop.f32.mrb[2].mxu1  ;;  %v718_v10 = vpop.permute.xlu0 %717 }
 0x1fb   :  { %v1761_v12 = vpop.f32.mrb[3].mxu1 }
 0x1fc   :  { %v1020_v14 = vadd.f32 %v1759_v9, %v668_v58  ;;  %v1762_v7 = vadd.f32 %v1761_v12, %v1760_v23 }
 0x1fe   :  { %v1023_v5 = vadd.f32 %v1762_v7, %v673_v59  ;;  %v1146_v13 = vmax.f32 %v1020_v14, 0.0  ;;  %v723_v14 = vpop.permute.xlu1 %722 }
 0x200   :  { %v1147_v47 = vmax.f32 %v1023_v5, 0.0  ;;  %v1763_v16 = vpop.f32.mrb[4].mxu1 }
 0x201   :  { %v1764_v4 = vpop.f32.mrb[5].mxu1 }
 0x202   :  { %v2696_v17 = vpack.c.bf16 %v1147_v47, %v1146_v13  ;;  %v1765_v18 = vadd.f32 %v1764_v4, %v1763_v16  ;;  %v1766_v42 = vpop.f32.mrb[6].mxu1  ;;  %v2712_v47 = vpop.permute.xlu0 %807 }
 0x203   :  { %v1767_v20 = vpop.f32.mrb[7].mxu1 }
 0x204   :  { %v1028_v50 = vadd.f32 %v1765_v18, %v678_v53  ;;  %v1768_v21 = vadd.f32 %v1767_v20, %v1766_v42 }
 0x206   :  { %v1031_v56 = vadd.f32 %v1768_v21, %v683_v61  ;;  %v1148_v62 = vmax.f32 %v1028_v50, 0.0 }
 0x208   :  { %v1149_v11 = vmax.f32 %v1031_v56, 0.0  ;;  %v1769_v6 = vpop.f32.mrb[8].mxu1  ;;  %v728_v56 = vpop.permute.xlu0 %727 }
 0x209   :  { %v1770_v24 = vpop.f32.mrb[9].mxu1 }
 0x20a   :  { %v2700_v26 = vpack.c.bf16 %v1149_v11, %v1148_v62  ;;  %v1771_v27 = vadd.f32 %v1770_v24, %v1769_v6  ;;  %v1772_v28 = vpop.f32.mrb[10].mxu1 }
 0x20b   :  { %v1773_v31 = vpop.f32.mrb[11].mxu1 }
 0x20c   :  { %v1036_v33 = vadd.f32 %v1771_v27, %v688_v29  ;;  %v1774_v34 = vadd.f32 %v1773_v31, %v1772_v28 }
 0x20e   :  { %v1039_v35 = vadd.f32 %v1774_v34, %v693_v54  ;;  %v1150_v38 = vmax.f32 %v1036_v33, 0.0 }
 0x210   :  { %v1151_v39 = vmax.f32 %v1039_v35, 0.0  ;;  %v1775_v40 = vpop.f32.mrb[12].mxu1 }
 0x211   :  { %v1776_v45 = vpop.f32.mrb[13].mxu1 }
 0x212   :  { %v2704_v46 = vpack.c.bf16 %v1151_v39, %v1150_v38  ;;  %v1777_v48 = vadd.f32 %v1776_v45, %v1775_v40  ;;  %v1778_v49 = vpop.f32.mrb[14].mxu1  ;;  %v2720_v38 = vpop.permute.xlu0 %817 }
 0x213   :  { %v1779_v43 = vpop.f32.mrb[15].mxu1 }
 0x214   :  { %v1044_v51 = vadd.f32 %v1777_v48, %v698_v19  ;;  %v1780_v32 = vadd.f32 %v1779_v43, %v1778_v49  ;;  %v2716_v19 = vpop.permute.xlu1 %812 }
 0x216   :  { %v1047_v52 = vadd.f32 %v1780_v32, %v703_v25  ;;  %v1152_v58 = vmax.f32 %v1044_v51, 0.0 }
 0x218   :  { %v1153_v59 = vmax.f32 %v1047_v52, 0.0  ;;  %v1781_v53 = vpop.f32.mrb[16].mxu1  ;;  %v733_v24 = vpop.permute.xlu1 %732 }
 0x219   :  { %v1782_v61 = vpop.f32.mrb[17].mxu1  ;;  %v738_v52 = vpop.permute.xlu0 %737 }
 0x21a   :  { %v2710_v29 = vpack.c.bf16 %v1153_v59, %v1152_v58  ;;  %v1783_v2 = vadd.f32 %v1782_v61, %v1781_v53  ;;  %v1784_v54 = vpop.f32.mrb[18].mxu1 }
 0x21b   :  { %v1785_v9 = vpop.f32.mrb[19].mxu1 }
 0x21c   :  { %v1052_v23 = vadd.f32 %v1783_v2, %v708_v37  ;;  %v1786_v12 = vadd.f32 %v1785_v9, %v1784_v54  ;;  %v2722_v40 = vpop.permute.xlu1 %822 }
 0x21e   :  { %v1055_v7 = vadd.f32 %v1786_v12, %v713_v41  ;;  %v1154_v3 = vmax.f32 %v1052_v23, 0.0 }
 0x220   :  { %v1155_v5 = vmax.f32 %v1055_v7, 0.0  ;;  %v1787_v13 = vpop.f32.mrb[20].mxu1  ;;  %v743_v61 = vpop.permute.xlu1 %742 }
 0x221   :  { %v1788_v16 = vpop.f32.mrb[21].mxu1 }
 0x222   :  { %v2714_v4 = vpack.c.bf16 %v1155_v5, %v1154_v3  ;;  %v1789_v18 = vadd.f32 %v1788_v16, %v1787_v13  ;;  %v1790_v42 = vpop.f32.mrb[22].mxu1 }
 0x223   :  { %v1791_v20 = vpop.f32.mrb[23].mxu1 }
 0x224   :  { %v1060_v50 = vadd.f32 %v1789_v18, %v718_v10  ;;  %v1792_v21 = vadd.f32 %v1791_v20, %v1790_v42 }
 0x226   :  { %v1063_v25 = vadd.f32 %v1792_v21, %v723_v14  ;;  %v1156_v62 = vmax.f32 %v1060_v50, 0.0 }
 0x228   :  { %v1157_v11 = vmax.f32 %v1063_v25, 0.0  ;;  %v1793_v6 = vpop.f32.mrb[24].mxu1 }
 0x229   :  { %v1794_v27 = vpop.f32.mrb[25].mxu1 }
 0x22a   :  { %v2718_v28 = vpack.c.bf16 %v1157_v11, %v1156_v62  ;;  %v1795_v31 = vadd.f32 %v1794_v27, %v1793_v6  ;;  %v1796_v33 = vpop.f32.mrb[26].mxu1 }
 0x22b   :  { %v1797_v34 = vpop.f32.mrb[27].mxu1 }
 0x22c   :  { %v1068_v35 = vadd.f32 %v1795_v31, %v728_v56  ;;  %v1798_v37 = vadd.f32 %v1797_v34, %v1796_v33 }
 0x22e   :  { %v1071_v39 = vadd.f32 %v1798_v37, %v733_v24  ;;  %v1158_v41 = vmax.f32 %v1068_v35, 0.0 }
 0x230   :  { %v1159_v45 = vmax.f32 %v1071_v39, 0.0  ;;  %v1799_v48 = vpop.f32.mrb[28].mxu1 }
 0x231   :  { %v1800_v49 = vpop.f32.mrb[29].mxu1 }
 0x232   :  { %v2724_v43 = vpack.c.bf16 %v1159_v45, %v1158_v41  ;;  %v1801_v51 = vadd.f32 %v1800_v49, %v1799_v48  ;;  %v1802_v32 = vpop.f32.mrb[30].mxu1 }
 0x233   :  { %v1803_v58 = vpop.f32.mrb[31].mxu1 }
 0x234   :  { %v1076_v59 = vadd.f32 %v1801_v51, %v738_v52  ;;  %v1804_v53 = vadd.f32 %v1803_v58, %v1802_v32 }
 0x236   :  { %v1079_v2 = vadd.f32 %v1804_v53, %v743_v61  ;;  %v1160_v54 = vmax.f32 %v1076_v59, 0.0 }
 0x238   :  { %v1161_v10 = vmax.f32 %v1079_v2, 0.0  ;;  %v1805_v9 = vpop.f32.mrb[32].mxu1 }
 0x239   :  { %v1806_v23 = vpop.f32.mrb[33].mxu1 }
 0x23a   :  { %v2726_v12 = vpack.c.bf16 %v1161_v10, %v1160_v54  ;;  %v1807_v14 = vadd.f32 %v1806_v23, %v1805_v9  ;;  %v1808_v7 = vpop.f32.mrb[34].mxu1 }
 0x23b   :  { %v1809_v3 = vpop.f32.mrb[35].mxu1 }
 0x23c   :  { %v1084_v5 = vadd.f32 %v1807_v14, %v2677_v36  ;;  %v1810_v13 = vadd.f32 %v1809_v3, %v1808_v7 }
 0x23e   :  { %v1087_v16 = vadd.f32 %v1810_v13, %v2679_v57  ;;  %v1162_v18 = vmax.f32 %v1084_v5, 0.0 }
 0x240   :  { %v1163_v42 = vmax.f32 %v1087_v16, 0.0  ;;  %v1811_v20 = vpop.f32.mrb[36].mxu1 }
 0x241   :  { %v1812_v50 = vpop.f32.mrb[37].mxu1 }
 0x242   :  { %v1813_v21 = vadd.f32 %v1812_v50, %v1811_v20  ;;  %v1814_v25 = vpop.f32.mrb[38].mxu1  ;;  %v1186_v56 = vpack.c.bf16 %v1163_v42, %v1162_v18 }
 0x243   :  { %v1815_v62 = vpop.f32.mrb[39].mxu1 }
 0x244   :  { %v1092_v11 = vadd.f32 %v1813_v21, %v2681_v63  ;;  %v1816_v6 = vadd.f32 %v1815_v62, %v1814_v25  ;;  %1853 = vmatprep.subr.bf16.mxu0 %v1186_v56 }
 0x245   :  { %1854 = vmatpush3.bf16.msra.mxu0 %v2696_v17 }
 0x246   :  { %v1095_v24 = vadd.f32 %v1816_v6, %v2683_v60  ;;  %v1164_v36 = vmax.f32 %v1092_v11, 0.0 }
 0x248   :  { %v1165_v27 = vmax.f32 %v1095_v24, 0.0  ;;  %v1817_v31 = vpop.f32.mrb[40].mxu1 }
 0x249   :  { %v1818_v57 = vpop.f32.mrb[41].mxu1 }
 0x24a   :  { %v1819_v33 = vadd.f32 %v1818_v57, %v1817_v31  ;;  %v1820_v34 = vpop.f32.mrb[42].mxu1  ;;  %v1187_v35 = vpack.c.bf16 %v1165_v27, %v1164_v36 }
 0x24b   :  { %v1821_v37 = vpop.f32.mrb[43].mxu1 }
 0x24c   :  { %v1100_v39 = vadd.f32 %v1819_v33, %v2685_v0  ;;  %v1822_v41 = vadd.f32 %v1821_v37, %v1820_v34  ;;  %1855 = vmatprep.subr.bf16.mxu0 %v1187_v35 }
 0x24d   :  { %1856 = vmatpush3.bf16.msra.mxu0 %v2700_v26 }
 0x24e   :  { %v1103_v63 = vadd.f32 %v1822_v41, %v2687_v1  ;;  %v1166_v45 = vmax.f32 %v1100_v39, 0.0 }
 0x250   :  { %v1167_v17 = vmax.f32 %v1103_v63, 0.0  ;;  %v1823_v48 = vpop.f32.mrb[44].mxu1  ;;  %v2031_v63 = vld [vmem:[%s2841_s5 + $0x34] ss:$8 sps:$4 sm:$0xff]  }
 0x251   :  { %v1824_v60 = vpop.f32.mrb[45].mxu1 }
 0x252   :  { %v1825_v49 = vadd.f32 %v1824_v60, %v1823_v48  ;;  %v1826_v51 = vpop.f32.mrb[46].mxu1  ;;  %v1188_v32 = vpack.c.bf16 %v1167_v17, %v1166_v45  ;;  %v2033_v45 = vld [vmem:[%s2841_s5 + $0x30] ss:$8 sps:$4 sm:$0xff]   ;;  %v2034_v17 = vld [vmem:[%s2841_s5 + $0x44] ss:$8 sps:$4 sm:$0xff]  }
 0x253   :  { %v1827_v52 = vpop.f32.mrb[47].mxu1  ;;  %v2036_v48 = vld [vmem:[%s2841_s5 + $0x40] ss:$8 sps:$4 sm:$0xff]   ;;  %v2037_v60 = vld [vmem:[%s2841_s5 + $0x54] ss:$8 sps:$4 sm:$0xff]  }
 0x254   :  { %v1108_v58 = vadd.f32 %v1825_v49, %v2689_v15  ;;  %v1828_v59 = vadd.f32 %v1827_v52, %v1826_v51  ;;  %1857 = vmatprep.subr.bf16.mxu0 %v1188_v32  ;;  %v2039_v49 = vld [vmem:[%s2841_s5 + $0x50] ss:$8 sps:$4 sm:$0xff]   ;;  %v2040_v51 = vld [vmem:[%s2841_s5 + $0x64] ss:$8 sps:$4 sm:$0xff]   ;;  %v2042_v32 = vld [vmem:[%s2841_s5 + $0x60] ss:$8 sps:$4 sm:$0xff]  }
 0x255   :  { %1858 = vmatpush3.bf16.msra.mxu0 %v2704_v46  ;;  %v2043_v52 = vld [vmem:[%s2841_s5 + $0x74] ss:$8 sps:$4 sm:$0xff]  }
 0x256   :  { %v1111_v0 = vadd.f32 %v1828_v59, %v2694_v8  ;;  %v1168_v53 = vmax.f32 %v1108_v58, 0.0  ;;  %v2045_v58 = vld [vmem:[%s2841_s5 + $0x70] ss:$8 sps:$4 sm:$0xff]   ;;  %v1229_v59 = vpop.permute.xlu0 %1228 }
 0x258   :  { %v1169_v26 = vmax.f32 %v1111_v0, 0.0  ;;  %v1829_v61 = vpop.f32.mrb[48].mxu1  ;;  %v1234_v0 = vpop.permute.xlu1 %1233 }
 0x259   :  { %v1830_v1 = vpop.f32.mrb[49].mxu1 }
 0x25a   :  { %v1831_v2 = vadd.f32 %v1830_v1, %v1829_v61  ;;  %v1832_v54 = vpop.f32.mrb[50].mxu1  ;;  %v1189_v10 = vpack.c.bf16 %v1169_v26, %v1168_v53  ;;  %v1239_v53 = vpop.permute.xlu0 %1238 }
 0x25b   :  { %v1833_v9 = vpop.f32.mrb[51].mxu1 }
 0x25c   :  { %v1116_v23 = vadd.f32 %v1831_v2, %v2698_v22  ;;  %v1834_v14 = vadd.f32 %v1833_v9, %v1832_v54  ;;  %1859 = vmatprep.subr.bf16.mxu0 %v1189_v10  ;;  %v1244_v26 = vpop.permute.xlu1 %1243 }
 0x25d   :  { %1860 = vmatpush3.bf16.msra.mxu0 %v2710_v29 }
 0x25e   :  { %v1119_v15 = vadd.f32 %v1834_v14, %v2702_v30  ;;  %v1170_v7 = vmax.f32 %v1116_v23, 0.0  ;;  %v1249_v61 = vpop.permute.xlu0 %1248 }
 0x260   :  { %v1171_v46 = vmax.f32 %v1119_v15, 0.0  ;;  %v1835_v3 = vpop.f32.mrb[52].mxu1  ;;  %v1254_v1 = vpop.permute.xlu1 %1253 }
 0x261   :  { %v1836_v8 = vpop.f32.mrb[53].mxu1 }
 0x262   :  { %v1837_v5 = vadd.f32 %v1836_v8, %v1835_v3  ;;  %v1838_v13 = vpop.f32.mrb[54].mxu1  ;;  %v1190_v16 = vpack.c.bf16 %v1171_v46, %v1170_v7  ;;  %v1259_v2 = vpop.permute.xlu0 %1258 }
 0x263   :  { %v1839_v18 = vpop.f32.mrb[55].mxu1 }
 0x264   :  { %v1124_v42 = vadd.f32 %v1837_v5, %v2706_v44  ;;  %v1840_v20 = vadd.f32 %v1839_v18, %v1838_v13  ;;  %1861 = vmatprep.subr.bf16.mxu0 %v1190_v16  ;;  %v2797_v54 = vpop.permute.xlu1 %1263 }
 0x265   :  { %1862 = vmatpush3.bf16.msra.mxu0 %v2714_v4 }
 0x266   :  { %v1127_v22 = vadd.f32 %v1840_v20, %v2708_v55  ;;  %v1172_v50 = vmax.f32 %v1124_v42, 0.0  ;;  %v2799_v10 = vpop.permute.xlu0 %1268 }
 0x268   :  { %v1173_v29 = vmax.f32 %v1127_v22, 0.0  ;;  %v1841_v21 = vpop.f32.mrb[56].mxu1  ;;  %v2801_v9 = vpop.permute.xlu1 %1273 }
 0x269   :  { %v1842_v30 = vpop.f32.mrb[57].mxu1 }
 0x26a   :  { %v1843_v25 = vadd.f32 %v1842_v30, %v1841_v21  ;;  %v1844_v56 = vpop.f32.mrb[58].mxu1  ;;  %v1191_v62 = vpack.c.bf16 %v1173_v29, %v1172_v50  ;;  %v2803_v23 = vpop.permute.xlu0 %1278 }
 0x26b   :  { %v1845_v11 = vpop.f32.mrb[59].mxu1 }
 0x26c   :  { %v1132_v6 = vadd.f32 %v1843_v25, %v2712_v47  ;;  %v1846_v24 = vadd.f32 %v1845_v11, %v1844_v56  ;;  %1863 = vmatprep.subr.bf16.mxu0 %v1191_v62  ;;  %v2805_v14 = vpop.permute.xlu1 %1283 }
 0x26d   :  { %1864 = vmatpush3.bf16.msra.mxu0 %v2718_v28 }
 0x26e   :  { %v1135_v44 = vadd.f32 %v1846_v24, %v2716_v19  ;;  %v1174_v36 = vmax.f32 %v1132_v6, 0.0  ;;  %v2022_v19 = vld [vmem:[%s2841_s5] ss:$8 sps:$4 sm:$0xff]   ;;  %v2807_v5 = vpop.permute.xlu0 %1288 }
 0x270   :  { %v1175_v4 = vmax.f32 %v1135_v44, 0.0  ;;  %v1847_v27 = vpop.f32.mrb[60].mxu1  ;;  %v2809_v18 = vpop.permute.xlu1 %1293 }
 0x271   :  { %v1848_v55 = vpop.f32.mrb[61].mxu1 }
 0x272   :  { %v1849_v31 = vadd.f32 %v1848_v55, %v1847_v27  ;;  %v1850_v57 = vpop.f32.mrb[62].mxu1  ;;  %v1192_v33 = vpack.c.bf16 %v1175_v4, %v1174_v36  ;;  %v2811_v50 = vpop.permute.xlu0 %1298 }
 0x273   :  { %v1851_v34 = vpop.f32.mrb[63].mxu1 }
 0x274   :  { %v1140_v35 = vadd.f32 %v1849_v31, %v2720_v38  ;;  %v1852_v37 = vadd.f32 %v1851_v34, %v1850_v57  ;;  %1865 = vmatprep.subr.bf16.mxu0 %v1192_v33  ;;  %v2025_v38 = vld [vmem:[%s2841_s5 + $0x14] ss:$8 sps:$4 sm:$0xff]   ;;  %v2813_v25 = vpop.permute.xlu1 %1303 }
 0x275   :  { %1866 = vmatpush3.bf16.msra.mxu0 %v2724_v43  ;;  %v2028_v43 = vld [vmem:[%s2841_s5 + $0x24] ss:$8 sps:$4 sm:$0xff]  }
 0x276   :  { %v1143_v47 = vadd.f32 %v1852_v37, %v2722_v40  ;;  %v1176_v39 = vmax.f32 %v1140_v35, 0.0  ;;  %v2027_v40 = vld [vmem:[%s2841_s5 + $0x10] ss:$8 sps:$4 sm:$0xff]   ;;  %v1518_v24 = vpop.permute.xlu0 %1517 }
 0x278   :  { %v1177_v28 = vmax.f32 %v1143_v47, 0.0  ;;  %v1523_v55 = vpop.permute.xlu1 %1522 }
 0x27a   :  { %v1193_v41 = vpack.c.bf16 %v1177_v28, %v1176_v39  ;;  %v1528_v28 = vpop.permute.xlu0 %1527 }
 0x27c   :  { %1867 = vmatprep.subr.bf16.mxu0 %v1193_v41 }
 0x27d   :  { %1868 = vmatpush3.bf16.msra.mxu0 %v2726_v12  ;;  %v2030_v12 = vld [vmem:[%s2841_s5 + $0x20] ss:$8 sps:$4 sm:$0xff]   ;;  %s2103_s5 = smov [#allocation2]  }
 0x27e   :  { %s1632_s16 = sshll.u32 %s2103_s5, 4  ;;  %s1633_s16 = int_to_ptr.vmem [resolvable:$true] %s1632_s16 }
 0x27f   :  { %s2078_s17 = scalar_lea.vmem %s1633_s16, 2048  ;;  %p2083_p1 = scmp.lt.s32.totalorder %s1633_s16, %s1633_s16 }
 0x280   :  { %1419 = vmatmul.mubr.bf16.vlgmr.msra.gmra.mrb[32].mxu0 %v2022_v19  ;;  %p2079_p0 = scmp.ne.s32.totalorder %s1633_s16, %s2078_s17  ;;  %p2084_p2 = scmp.lt.s32.totalorder %s2078_s17, %s2078_s17 }
 0x281   :  { %1426 = vmatprep.mubr.bf16.mxu0 %v2025_v38 }
 0x282   :  { %p2085_p3 = por %p2084_p2, %p2083_p1 }
 0x284   :  { %p2086_p4 = pnand %p2085_p3, %p2079_p0 }
 0x288   :  { %1427 = vmatmul.mubr.bf16.gmra.mrb[36].mxu0 %v2027_v40 }
 0x289   :  { %1434 = vmatprep.mubr.bf16.mxu0 %v2028_v43  ;;  %v1533_v43 = vpop.permute.xlu1 %1532 }
 0x290   :  { %1435 = vmatmul.mubr.bf16.gmra.mrb[40].mxu0 %v2030_v12 }
 0x291   :  { %1442 = vmatprep.mubr.bf16.mxu0 %v2031_v63 }
 0x298   :  { %1443 = vmatmul.mubr.bf16.gmra.mrb[44].mxu0 %v2033_v45 }
 0x299   :  { %1450 = vmatprep.mubr.bf16.mxu0 %v2034_v17 }
 0x2a0   :  { %1451 = vmatmul.mubr.bf16.gmra.mrb[48].mxu0 %v2036_v48 }
 0x2a1   :  { %1458 = vmatprep.mubr.bf16.mxu0 %v2037_v60 }
 0x2a8   :  { %1459 = vmatmul.mubr.bf16.gmra.mrb[52].mxu0 %v2039_v49 }
 0x2a9   :  { %1466 = vmatprep.mubr.bf16.mxu0 %v2040_v51 }
 0x2b0   :  { %1467 = vmatmul.mubr.bf16.gmra.mrb[56].mxu0 %v2042_v32  ;;  %v1538_v32 = vpop.permute.xlu0 %1537 }
 0x2b1   :  { %1474 = vmatprep.mubr.bf16.mxu0 %v2043_v52 }
 0x2b8   :  { %1475 = vmatmul.mubr.bf16.gmra.mrb[60].mxu0 %v2045_v58 }
 0x353   :  { %v1869_v15 = vpop.f32.mrb[32].mxu0 }
 0x354   :  { %v1870_v7 = vpop.f32.mrb[33].mxu0 }
 0x355   :  { %v1871_v46 = vadd.f32 %v1870_v7, %v1869_v15  ;;  %v1872_v3 = vpop.f32.mrb[34].mxu0 }
 0x356   :  { %v1873_v8 = vpop.f32.mrb[35].mxu0 }
 0x357   :  { %v1421_v13 = vadd.f32 %v1871_v46, %v1229_v59  ;;  %v1874_v16 = vadd.f32 %v1873_v8, %v1872_v3  ;;  %v1548_v3 = vpop.permute.xlu0 %1547 }
 0x359   :  { %2046 = vtanh.f32 %v1421_v13  ;;  %v1424_v42 = vadd.f32 %v1874_v16, %v1234_v0 }
 0x35b   :  { %2048 = vtanh.f32 %v1424_v42  ;;  %v1875_v20 = vpop.f32.mrb[36].mxu0 }
 0x35c   :  { %v1876_v22 = vpop.f32.mrb[37].mxu0 }
 0x35d   :  { %v1877_v29 = vadd.f32 %v1876_v22, %v1875_v20  ;;  %v1878_v21 = vpop.f32.mrb[38].mxu0 }
 0x35e   :  { %v1879_v30 = vpop.f32.mrb[39].mxu0 }
 0x35f   :  { %v1429_v56 = vadd.f32 %v1877_v29, %v1239_v53  ;;  %v1880_v62 = vadd.f32 %v1879_v30, %v1878_v21  ;;  %v1543_v53 = vpop.permute.xlu1 %1542 }
 0x361   :  { %2050 = vtanh.f32 %v1429_v56  ;;  %v1432_v11 = vadd.f32 %v1880_v62, %v1244_v26 }
 0x363   :  { %v2047_v6 = vpop.eup %2046  ;;  %2052 = vtanh.f32 %v1432_v11  ;;  %v1881_v44 = vpop.f32.mrb[40].mxu0 }
 0x364   :  { %v1595_v36 = vmul.f32 %v2047_v6, %v1518_v24  ;;  %v1882_v4 = vpop.f32.mrb[41].mxu0  ;;  %v1553_v20 = vpop.permute.xlu1 %1552 }
 0x365   :  { %v2049_v27 = vpop.eup %2048  ;;  %v1883_v31 = vadd.f32 %v1882_v4, %v1881_v44  ;;  %v1884_v57 = vpop.f32.mrb[42].mxu0 }
 0x366   :  { %1611 = vst [vmem:[#allocation2] sm:$0xff] %v1595_v36  ;;  %v1596_v33 = vmul.f32 %v2049_v27, %v1523_v55  ;;  %v1885_v34 = vpop.f32.mrb[43].mxu0  ;;  %v1558_v11 = vpop.permute.xlu0 %1557 }
 0x367   :  { %v1437_v35 = vadd.f32 %v1883_v31, %v1249_v61  ;;  %v1886_v37 = vadd.f32 %v1885_v34, %v1884_v57 }
 0x368   :  { %1612 = vst [vmem:[#allocation2 + $0x8] sm:$0xff] %v1596_v33  ;;  %v1563_v4 = vpop.permute.xlu1 %1562 }
 0x369   :  { %2054 = vtanh.f32 %v1437_v35  ;;  %v1440_v47 = vadd.f32 %v1886_v37, %v1254_v1 }
 0x36a   :  { %v1568_v35 = vpop.permute.xlu0 %1567 }
 0x36b   :  { %v2051_v39 = vpop.eup %2050  ;;  %2056 = vtanh.f32 %v1440_v47  ;;  %v1887_v41 = vpop.f32.mrb[44].mxu0 }
 0x36c   :  { %v1597_v19 = vmul.f32 %v2051_v39, %v1528_v28  ;;  %v1888_v38 = vpop.f32.mrb[45].mxu0 }
 0x36d   :  { %v2053_v40 = vpop.eup %2052  ;;  %v1889_v12 = vadd.f32 %v1888_v38, %v1887_v41  ;;  %v1890_v63 = vpop.f32.mrb[46].mxu0 }
 0x36e   :  { %1613 = vst [vmem:[#allocation2 + $0x10] sm:$0xff] %v1597_v19  ;;  %v1598_v45 = vmul.f32 %v2053_v40, %v1533_v43  ;;  %v1891_v17 = vpop.f32.mrb[47].mxu0  ;;  %v1573_v41 = vpop.permute.xlu1 %1572 }
 0x36f   :  { %v1445_v48 = vadd.f32 %v1889_v12, %v1259_v2  ;;  %v1892_v60 = vadd.f32 %v1891_v17, %v1890_v63 }
 0x370   :  { %1614 = vst [vmem:[#allocation2 + $0x18] sm:$0xff] %v1598_v45  ;;  %v1578_v45 = vpop.permute.xlu0 %1577 }
 0x371   :  { %2058 = vtanh.f32 %v1445_v48  ;;  %v1448_v49 = vadd.f32 %v1892_v60, %v2797_v54 }
 0x372   :  { %v1583_v60 = vpop.permute.xlu1 %1582 }
 0x373   :  { %v2055_v51 = vpop.eup %2054  ;;  %2060 = vtanh.f32 %v1448_v49  ;;  %v1893_v52 = vpop.f32.mrb[48].mxu0 }
 0x374   :  { %v1599_v58 = vmul.f32 %v2055_v51, %v1538_v32  ;;  %v1894_v59 = vpop.f32.mrb[49].mxu0  ;;  %v1588_v32 = vpop.permute.xlu0 %1587 }
 0x375   :  { %v2057_v0 = vpop.eup %2056  ;;  %v1895_v26 = vadd.f32 %v1894_v59, %v1893_v52  ;;  %v1896_v61 = vpop.f32.mrb[50].mxu0 }
 0x376   :  { %1615 = vst [vmem:[#allocation2 + $0x20] sm:$0xff] %v1599_v58  ;;  %v1600_v1 = vmul.f32 %v2057_v0, %v1543_v53  ;;  %v1897_v15 = vpop.f32.mrb[51].mxu0  ;;  %v1593_v58 = vpop.permute.xlu1 %1592 }
 0x377   :  { %v1453_v2 = vadd.f32 %v1895_v26, %v2799_v10  ;;  %v1898_v7 = vadd.f32 %v1897_v15, %v1896_v61 }
 0x378   :  { %1616 = vst [vmem:[#allocation2 + $0x28] sm:$0xff] %v1600_v1 }
 0x379   :  { %2062 = vtanh.f32 %v1453_v2  ;;  %v1456_v54 = vadd.f32 %v1898_v7, %v2801_v9 }
 0x37b   :  { %v2059_v46 = vpop.eup %2058  ;;  %2064 = vtanh.f32 %v1456_v54  ;;  %v1899_v8 = vpop.f32.mrb[52].mxu0 }
 0x37c   :  { %v1601_v13 = vmul.f32 %v2059_v46, %v1548_v3  ;;  %v1900_v16 = vpop.f32.mrb[53].mxu0 }
 0x37d   :  { %v2061_v42 = vpop.eup %2060  ;;  %v1901_v22 = vadd.f32 %v1900_v16, %v1899_v8  ;;  %v1902_v29 = vpop.f32.mrb[54].mxu0 }
 0x37e   :  { %1617 = vst [vmem:[#allocation2 + $0x30] sm:$0xff] %v1601_v13  ;;  %v1602_v21 = vmul.f32 %v2061_v42, %v1553_v20  ;;  %v1903_v30 = vpop.f32.mrb[55].mxu0 }
 0x37f   :  { %v1461_v10 = vadd.f32 %v1901_v22, %v2803_v23  ;;  %v1904_v56 = vadd.f32 %v1903_v30, %v1902_v29 }
 0x380   :  { %1618 = vst [vmem:[#allocation2 + $0x38] sm:$0xff] %v1602_v21 }
 0x381   :  { %2066 = vtanh.f32 %v1461_v10  ;;  %v1464_v9 = vadd.f32 %v1904_v56, %v2805_v14 }
 0x383   :  { %v2063_v62 = vpop.eup %2062  ;;  %2068 = vtanh.f32 %v1464_v9  ;;  %v1905_v6 = vpop.f32.mrb[56].mxu0 }
 0x384   :  { %v1603_v24 = vmul.f32 %v2063_v62, %v1558_v11  ;;  %v1906_v44 = vpop.f32.mrb[57].mxu0 }
 0x385   :  { %v2065_v36 = vpop.eup %2064  ;;  %v1907_v27 = vadd.f32 %v1906_v44, %v1905_v6  ;;  %v1908_v55 = vpop.f32.mrb[58].mxu0 }
 0x386   :  { %1619 = vst [vmem:[#allocation2 + $0x40] sm:$0xff] %v1603_v24  ;;  %v1604_v31 = vmul.f32 %v2065_v36, %v1563_v4  ;;  %v1909_v57 = vpop.f32.mrb[59].mxu0 }
 0x387   :  { %v1469_v23 = vadd.f32 %v1907_v27, %v2807_v5  ;;  %v1910_v33 = vadd.f32 %v1909_v57, %v1908_v55 }
 0x388   :  { %1620 = vst [vmem:[#allocation2 + $0x48] sm:$0xff] %v1604_v31 }
 0x389   :  { %2070 = vtanh.f32 %v1469_v23  ;;  %v1472_v14 = vadd.f32 %v1910_v33, %v2809_v18 }
 0x38b   :  { %v2067_v34 = vpop.eup %2066  ;;  %2072 = vtanh.f32 %v1472_v14  ;;  %v1911_v37 = vpop.f32.mrb[60].mxu0 }
 0x38c   :  { %v1605_v47 = vmul.f32 %v2067_v34, %v1568_v35  ;;  %v1912_v39 = vpop.f32.mrb[61].mxu0 }
 0x38d   :  { %v2069_v28 = vpop.eup %2068  ;;  %v1913_v19 = vadd.f32 %v1912_v39, %v1911_v37  ;;  %v1914_v38 = vpop.f32.mrb[62].mxu0 }
 0x38e   :  { %1621 = vst [vmem:[#allocation2 + $0x50] sm:$0xff] %v1605_v47  ;;  %v1606_v40 = vmul.f32 %v2069_v28, %v1573_v41  ;;  %v1915_v43 = vpop.f32.mrb[63].mxu0 }
 0x38f   :  { %v1477_v5 = vadd.f32 %v1913_v19, %v2811_v50  ;;  %v1916_v12 = vadd.f32 %v1915_v43, %v1914_v38 }
 0x390   :  { %1622 = vst [vmem:[#allocation2 + $0x58] sm:$0xff] %v1606_v40 }
 0x391   :  { %2074 = vtanh.f32 %v1477_v5  ;;  %v1480_v18 = vadd.f32 %v1916_v12, %v2813_v25 }
 0x393   :  { %v2071_v63 = vpop.eup %2070  ;;  %2076 = vtanh.f32 %v1480_v18 }
 0x394   :  { %v1607_v17 = vmul.f32 %v2071_v63, %v1578_v45 }
 0x395   :  { %v2073_v48 = vpop.eup %2072 }
 0x396   :  { %1623 = vst [vmem:[#allocation2 + $0x60] sm:$0xff] %v1607_v17  ;;  %v1608_v49 = vmul.f32 %v2073_v48, %v1583_v60 }
 0x398   :  { %1624 = vst [vmem:[#allocation2 + $0x68] sm:$0xff] %v1608_v49 }
 0x39b   :  { %v2075_v51 = vpop.eup %2074 }
 0x39c   :  { %v1609_v52 = vmul.f32 %v2075_v51, %v1588_v32 }
 0x39d   :  { %v2077_v50 = vpop.eup %2076 }
 0x39e   :  { %1625 = vst [vmem:[#allocation2 + $0x70] sm:$0xff] %v1609_v52  ;;  %v1610_v59 = vmul.f32 %v2077_v50, %v1593_v58 }
 0x3a0   :  { %1626 = vst [vmem:[#allocation2 + $0x78] sm:$0xff] %v1610_v59 }
 0x3a1   :  { %2089 = shalt.err (!%p2086_p4)
}
 0x3a2   :  { %s2090_s19 = scalar_lea.hbm %s2844_s8, 2048 }
 0x3a3   :  { %p2091_p5 = scmp.ne.s32.totalorder %s2844_s8, %s2090_s19  ;;  %p2094_p6 = scmp.lt.u32.totalorder %s2090_s19, %s2844_s8 }
 0x3a5   :  { %p2096_p7 = pnand %p2094_p6, %p2091_p5 }
 0x3a7   :  { %2099 = shalt.err (!%p2096_p7)
}
 0x3a8   :  { %s2104_s24 = smov 128   ;;  %s2105_s25 = smov 8  }
 0x3a9   :  { %1638 = dma.vmem_to_hbm [thread:$0]  %s1633_s16, 2048, %s2844_s8, [#allocation3], %s2104_s24, %s2104_s24, %s2105_s25  }
 0x3aa   :  { %2100 = dma.done.wait [#allocation3], 2048  }
 0x3ab   :  { %2101 = vsyncadd [#allocation3], 4294965248 }
 0x3ac   :  { %1642 = vsyncpa [#allocation3], 1 }

// kernel: tpu_custom_call.1
= control target key start
LH: loop header
LB: loop body
LE: loop exit
PB: predicated region body
PF: predicated region fallthrough
CT: control target
= control target key end

     0   :  { %v2102_v2 = vmov 0   ;;  %vm343_vm0 = vcmask 130048   ;;  %s2836_s0 = inlined_call_operand.vmem [shape: bf16[16,128], index: 0, kind: input, shape index: {}]   ;;  %s2837_s1 = inlined_call_operand.vmem [shape: bf16[256,16], index: 1, kind: input, shape index: {}]   ;;  %s2838_s2 = inlined_call_operand.vmem [shape: f32[256,1], index: 2, kind: input, shape index: {}]   ;;  %s2839_s3 = inlined_call_operand.vmem [shape: bf16[256,256], index: 3, kind: input, shape index: {}]   ;;  %s2840_s4 = inlined_call_operand.vmem [shape: f32[256,1], index: 4, kind: input, shape index: {}]   ;;  %s2841_s5 = inlined_call_operand.vmem [shape: bf16[128,256], index: 5, kind: input, shape index: {}]   ;;  %s2842_s6 = inlined_call_operand.vmem [shape: f32[128,1], index: 6, kind: input, shape index: {}]   ;;  %s2843_s7 = inlined_call_operand.vmem [shape: f32[128,1], index: 7, kind: input, shape index: {}]   ;;  %s2844_s8 = inlined_call_operand.hbm [shape: f32[128,128], index: 8, kind: output, shape index: {}]  }
   0x1   :  { %v81_v0 = vld [vmem:[%s2838_s2 + $0x80] sm:$0xff]  ;;  %1956 = vset.pattern.permute.xlu1 %v2102_v2  ;;  %1955 = vset.pattern.permute.xlu0 %v2102_v2  ;;  %v82_v4 = vld [vmem:[%s2838_s2 + $0x88] sm:$0xff]  ;;  %v1960_v8 = vld [vmem:[%s2837_s1 + $0x10] sm:$0xff]  }
   0x2   :  { %v65_v1 = vld [vmem:[%s2838_s2] sm:$0xff]  ;;  %179 = vperm.xlu0 %1955, %v81_v0   ;;  %v66_v5 = vld [vmem:[%s2838_s2 + $0x8] sm:$0xff]  ;;  %v83_v9 = vld [vmem:[%s2838_s2 + $0x90] sm:$0xff] }
   0x3   :  { %v1957_v3 = vld [vmem:[%s2836_s0] sm:$0xff]   ;;  %99 = vperm.xlu1 %1956, %v65_v1   ;;  %v1959_v7 = vld [vmem:[%s2837_s1 + $0x8] sm:$0xff]   ;;  %v84_v10 = vld [vmem:[%s2838_s2 + $0x98] sm:$0xff] }
   0x4   :  { %1917 = vmatprep.subr.bf16.mxu0 %v1957_v3  ;;  %v1958_v6 = vld [vmem:[%s2837_s1] sm:$0xff]   ;;  %v67_v11 = vld [vmem:[%s2838_s2 + $0x10] sm:$0xff]  ;;  %v68_v12 = vld [vmem:[%s2838_s2 + $0x18] sm:$0xff] }
   0x5   :  { %1918 = vmatpush3.bf16.msra.mxu0 %v1957_v3  ;;  %1919 = vmatprep.mubr.msk.bf16.mxu0 %vm343_vm0, %v1958_v6  ;;  %v1961_v13 = vld [vmem:[%s2837_s1 + $0x18] sm:$0xff]   ;;  %v1962_v14 = vld [vmem:[%s2837_s1 + $0x20] sm:$0xff]   ;;  %v86_v16 = vld [vmem:[%s2838_s2 + $0xa8] sm:$0xff] }
   0x6   :  { %184 = vperm.xlu0 %1955, %v82_v4   ;;  %v85_v15 = vld [vmem:[%s2838_s2 + $0xa0] sm:$0xff]  ;;  %v70_v18 = vld [vmem:[%s2838_s2 + $0x28] sm:$0xff]  ;;  %v1964_v20 = vld [vmem:[%s2837_s1 + $0x30] sm:$0xff]  }
   0x7   :  { %104 = vperm.xlu1 %1956, %v66_v5   ;;  %v69_v17 = vld [vmem:[%s2838_s2 + $0x20] sm:$0xff]  ;;  %v1963_v19 = vld [vmem:[%s2837_s1 + $0x28] sm:$0xff]   ;;  %v87_v21 = vld [vmem:[%s2838_s2 + $0xb0] sm:$0xff] }
   0x8   :  { %1920 = vmatmul.mubr.msk.bf16.vlgmr.msra.gmra.mrb[0].mxu0 %vm343_vm0, %v1959_v7  ;;  %v88_v22 = vld [vmem:[%s2838_s2 + $0xb8] sm:$0xff]  ;;  %v71_v23 = vld [vmem:[%s2838_s2 + $0x30] sm:$0xff]  ;;  %v1966_v26 = vld [vmem:[%s2837_s1 + $0x40] sm:$0xff]  }
   0x9   :  { %1923 = vmatprep.mubr.msk.bf16.mxu0 %vm343_vm0, %v1960_v8  ;;  %v72_v24 = vld [vmem:[%s2838_s2 + $0x38] sm:$0xff]  ;;  %v89_v27 = vld [vmem:[%s2838_s2 + $0xc0] sm:$0xff]  ;;  %v90_v28 = vld [vmem:[%s2838_s2 + $0xc8] sm:$0xff] }
   0xa   :  { %189 = vperm.xlu0 %1955, %v83_v9   ;;  %v1965_v25 = vld [vmem:[%s2837_s1 + $0x38] sm:$0xff]   ;;  %v73_v29 = vld [vmem:[%s2838_s2 + $0x40] sm:$0xff]  ;;  %v74_v30 = vld [vmem:[%s2838_s2 + $0x48] sm:$0xff] }
   0xb   :  { %194 = vperm.xlu1 %1956, %v84_v10   ;;  %v1967_v31 = vld [vmem:[%s2837_s1 + $0x48] sm:$0xff]   ;;  %v1968_v32 = vld [vmem:[%s2837_s1 + $0x50] sm:$0xff]   ;;  %v92_v34 = vld [vmem:[%s2838_s2 + $0xd8] sm:$0xff] }
   0xc   :  { %v91_v33 = vld [vmem:[%s2838_s2 + $0xd0] sm:$0xff]  ;;  %v76_v36 = vld [vmem:[%s2838_s2 + $0x58] sm:$0xff]  ;;  %v1970_v38 = vld [vmem:[%s2837_s1 + $0x60] sm:$0xff]  }
   0xd   :  { %v75_v35 = vld [vmem:[%s2838_s2 + $0x50] sm:$0xff]  ;;  %v1969_v37 = vld [vmem:[%s2837_s1 + $0x58] sm:$0xff]   ;;  %v93_v39 = vld [vmem:[%s2838_s2 + $0xe0] sm:$0xff] }
   0xe   :  { %109 = vperm.xlu0 %1955, %v67_v11   ;;  %v94_v40 = vld [vmem:[%s2838_s2 + $0xe8] sm:$0xff]  ;;  %v77_v41 = vld [vmem:[%s2838_s2 + $0x60] sm:$0xff]  ;;  %v1972_v44 = vld [vmem:[%s2837_s1 + $0x70] sm:$0xff]  }
   0xf   :  { %114 = vperm.xlu1 %1956, %v68_v12   ;;  %v78_v42 = vld [vmem:[%s2838_s2 + $0x68] sm:$0xff]  ;;  %v95_v45 = vld [vmem:[%s2838_s2 + $0xf0] sm:$0xff]  ;;  %v96_v46 = vld [vmem:[%s2838_s2 + $0xf8] sm:$0xff] }
  0x10   :  { %1924 = vmatmul.mubr.msk.bf16.gmra.mrb[4].mxu0 %vm343_vm0, %v1961_v13  ;;  %v1971_v43 = vld [vmem:[%s2837_s1 + $0x68] sm:$0xff]   ;;  %v79_v47 = vld [vmem:[%s2838_s2 + $0x70] sm:$0xff]  ;;  %v80_v48 = vld [vmem:[%s2838_s2 + $0x78] sm:$0xff] }
  0x11   :  { %1927 = vmatprep.mubr.msk.bf16.mxu0 %vm343_vm0, %v1962_v14  ;;  %v1973_v49 = vld [vmem:[%s2837_s1 + $0x78] sm:$0xff]   ;;  %v649_v50 = vld [vmem:[%s2840_s4 + $0x80] sm:$0xff]  ;;  %v650_v51 = vld [vmem:[%s2840_s4 + $0x88] sm:$0xff] }
  0x12   :  { %199 = vperm.xlu0 %1955, %v85_v15  }
  0x13   :  { %204 = vperm.xlu1 %1956, %v86_v16  }
  0x16   :  { %119 = vperm.xlu0 %1955, %v69_v17  }
  0x17   :  { %124 = vperm.xlu1 %1956, %v70_v18  }
  0x18   :  { %1928 = vmatmul.mubr.msk.bf16.gmra.mrb[8].mxu0 %vm343_vm0, %v1963_v19 }
  0x19   :  { %1931 = vmatprep.mubr.msk.bf16.mxu0 %vm343_vm0, %v1964_v20 }
  0x1a   :  { %209 = vperm.xlu0 %1955, %v87_v21  }
  0x1b   :  { %214 = vperm.xlu1 %1956, %v88_v22  }
  0x1e   :  { %129 = vperm.xlu0 %1955, %v71_v23  }
  0x1f   :  { %134 = vperm.xlu1 %1956, %v72_v24  }
  0x20   :  { %1932 = vmatmul.mubr.msk.bf16.gmra.mrb[12].mxu0 %vm343_vm0, %v1965_v25 }
  0x21   :  { %1935 = vmatprep.mubr.msk.bf16.mxu0 %vm343_vm0, %v1966_v26 }
  0x22   :  { %219 = vperm.xlu0 %1955, %v89_v27  }
  0x23   :  { %224 = vperm.xlu1 %1956, %v90_v28  }
  0x26   :  { %139 = vperm.xlu0 %1955, %v73_v29  }
  0x27   :  { %144 = vperm.xlu1 %1956, %v74_v30  }
  0x28   :  { %1936 = vmatmul.mubr.msk.bf16.gmra.mrb[16].mxu0 %vm343_vm0, %v1967_v31 }
  0x29   :  { %1939 = vmatprep.mubr.msk.bf16.mxu0 %vm343_vm0, %v1968_v32 }
  0x2a   :  { %229 = vperm.xlu0 %1955, %v91_v33  }
  0x2b   :  { %234 = vperm.xlu1 %1956, %v92_v34  }
  0x2e   :  { %149 = vperm.xlu0 %1955, %v75_v35  }
  0x2f   :  { %154 = vperm.xlu1 %1956, %v76_v36  }
  0x30   :  { %1940 = vmatmul.mubr.msk.bf16.gmra.mrb[20].mxu0 %vm343_vm0, %v1969_v37 }
  0x31   :  { %1943 = vmatprep.mubr.msk.bf16.mxu0 %vm343_vm0, %v1970_v38 }
  0x32   :  { %239 = vperm.xlu0 %1955, %v93_v39  }
  0x33   :  { %244 = vperm.xlu1 %1956, %v94_v40  }
  0x36   :  { %159 = vperm.xlu0 %1955, %v77_v41  }
  0x37   :  { %164 = vperm.xlu1 %1956, %v78_v42  }
  0x38   :  { %1944 = vmatmul.mubr.msk.bf16.gmra.mrb[24].mxu0 %vm343_vm0, %v1971_v43 }
  0x39   :  { %1947 = vmatprep.mubr.msk.bf16.mxu0 %vm343_vm0, %v1972_v44 }
  0x3a   :  { %249 = vperm.xlu0 %1955, %v95_v45  }
  0x3b   :  { %254 = vperm.xlu1 %1956, %v96_v46  }
  0x3e   :  { %169 = vperm.xlu0 %1955, %v79_v47  }
  0x3f   :  { %174 = vperm.xlu1 %1956, %v80_v48  }
  0x40   :  { %1948 = vmatmul.mubr.msk.bf16.gmra.mrb[28].mxu0 %vm343_vm0, %v1973_v49 }
  0x41   :  { %13 = vsyncpa [#allocation3], 0  ;;  %v633_v52 = vld [vmem:[%s2840_s4] sm:$0xff]  ;;  %v634_v53 = vld [vmem:[%s2840_s4 + $0x8] sm:$0xff] }
  0x42   :  { %747 = vperm.xlu0 %1955, %v649_v50   ;;  %v651_v54 = vld [vmem:[%s2840_s4 + $0x90] sm:$0xff]  ;;  %v652_v55 = vld [vmem:[%s2840_s4 + $0x98] sm:$0xff]  ;;  %v653_v58 = vld [vmem:[%s2840_s4 + $0xa0] sm:$0xff] }
  0x43   :  { %752 = vperm.xlu1 %1956, %v650_v51   ;;  %v635_v56 = vld [vmem:[%s2840_s4 + $0x10] sm:$0xff]  ;;  %v636_v57 = vld [vmem:[%s2840_s4 + $0x18] sm:$0xff]  ;;  %v654_v59 = vld [vmem:[%s2840_s4 + $0xa8] sm:$0xff] }
  0x44   :  { %v637_v60 = vld [vmem:[%s2840_s4 + $0x20] sm:$0xff]  ;;  %v638_v61 = vld [vmem:[%s2840_s4 + $0x28] sm:$0xff]  ;;  %v655_v62 = vld [vmem:[%s2840_s4 + $0xb0] sm:$0xff] }
  0x45   :  { %v656_v63 = vld [vmem:[%s2840_s4 + $0xb8] sm:$0xff]  ;;  %v639_v0 = vld [vmem:[%s2840_s4 + $0x30] sm:$0xff]  ;;  %v657_v2 = vld [vmem:[%s2840_s4 + $0xc0] sm:$0xff] }
  0x46   :  { %667 = vperm.xlu0 %1955, %v633_v52   ;;  %v640_v1 = vld [vmem:[%s2840_s4 + $0x38] sm:$0xff]  ;;  %v658_v3 = vld [vmem:[%s2840_s4 + $0xc8] sm:$0xff]  ;;  %v641_v4 = vld [vmem:[%s2840_s4 + $0x40] sm:$0xff] }
  0x47   :  { %672 = vperm.xlu1 %1956, %v634_v53   ;;  %v642_v5 = vld [vmem:[%s2840_s4 + $0x48] sm:$0xff]  ;;  %v659_v6 = vld [vmem:[%s2840_s4 + $0xd0] sm:$0xff]  ;;  %v660_v7 = vld [vmem:[%s2840_s4 + $0xd8] sm:$0xff] }
  0x48   :  { %v643_v8 = vld [vmem:[%s2840_s4 + $0x50] sm:$0xff]  ;;  %v644_v9 = vld [vmem:[%s2840_s4 + $0x58] sm:$0xff]  ;;  %v661_v10 = vld [vmem:[%s2840_s4 + $0xe0] sm:$0xff] }
  0x49   :  { %v662_v11 = vld [vmem:[%s2840_s4 + $0xe8] sm:$0xff]  ;;  %v645_v12 = vld [vmem:[%s2840_s4 + $0x60] sm:$0xff]  ;;  %v663_v14 = vld [vmem:[%s2840_s4 + $0xf0] sm:$0xff] }
  0x4a   :  { %757 = vperm.xlu0 %1955, %v651_v54   ;;  %v646_v13 = vld [vmem:[%s2840_s4 + $0x68] sm:$0xff]  ;;  %v664_v15 = vld [vmem:[%s2840_s4 + $0xf8] sm:$0xff]  ;;  %v647_v16 = vld [vmem:[%s2840_s4 + $0x70] sm:$0xff] }
  0x4b   :  { %762 = vperm.xlu1 %1956, %v652_v55   ;;  %v648_v17 = vld [vmem:[%s2840_s4 + $0x78] sm:$0xff]  ;;  %v1210_v18 = vld [vmem:[%s2842_s6] sm:$0xff]  ;;  %v1211_v19 = vld [vmem:[%s2842_s6 + $0x8] sm:$0xff] }
  0x4c   :  { %v1212_v20 = vld [vmem:[%s2842_s6 + $0x10] sm:$0xff]  ;;  %v1213_v21 = vld [vmem:[%s2842_s6 + $0x18] sm:$0xff]  ;;  %v1214_v22 = vld [vmem:[%s2842_s6 + $0x20] sm:$0xff] }
  0x4d   :  { %v1215_v23 = vld [vmem:[%s2842_s6 + $0x28] sm:$0xff]  ;;  %v1216_v24 = vld [vmem:[%s2842_s6 + $0x30] sm:$0xff]  ;;  %v1217_v25 = vld [vmem:[%s2842_s6 + $0x38] sm:$0xff] }
  0x4e   :  { %677 = vperm.xlu0 %1955, %v635_v56   ;;  %v1218_v26 = vld [vmem:[%s2842_s6 + $0x40] sm:$0xff]  ;;  %v1219_v27 = vld [vmem:[%s2842_s6 + $0x48] sm:$0xff]  ;;  %v1220_v28 = vld [vmem:[%s2842_s6 + $0x50] sm:$0xff] }
  0x4f   :  { %682 = vperm.xlu1 %1956, %v636_v57   ;;  %v1221_v29 = vld [vmem:[%s2842_s6 + $0x58] sm:$0xff]  ;;  %v1222_v30 = vld [vmem:[%s2842_s6 + $0x60] sm:$0xff]  ;;  %v1223_v31 = vld [vmem:[%s2842_s6 + $0x68] sm:$0xff] }
  0x50   :  { %v1224_v34 = vld [vmem:[%s2842_s6 + $0x70] sm:$0xff]  ;;  %v1225_v35 = vld [vmem:[%s2842_s6 + $0x78] sm:$0xff]  ;;  %v1499_v37 = vld [vmem:[%s2843_s7] sm:$0xff] }
  0x51   :  { %v1500_v38 = vld [vmem:[%s2843_s7 + $0x8] sm:$0xff]  ;;  %v1501_v41 = vld [vmem:[%s2843_s7 + $0x10] sm:$0xff]  ;;  %v1502_v42 = vld [vmem:[%s2843_s7 + $0x18] sm:$0xff] }
  0x52   :  { %767 = vperm.xlu0 %1955, %v653_v58   ;;  %v1976_v40 = vld [vmem:[%s2839_s3 + $0x4] ss:$8 sps:$4 sm:$0xff]   ;;  %v1505_v48 = vld [vmem:[%s2843_s7 + $0x30] sm:$0xff]  ;;  %v1506_v49 = vld [vmem:[%s2843_s7 + $0x38] sm:$0xff] }
  0x53   :  { %772 = vperm.xlu1 %1956, %v654_v59   ;;  %1017 = vmatprep.mubr.bf16.mxu1 %v1976_v40  ;;  %v1503_v45 = vld [vmem:[%s2843_s7 + $0x20] sm:$0xff]  ;;  %v1504_v46 = vld [vmem:[%s2843_s7 + $0x28] sm:$0xff]  ;;  %v1509_v55 = vld [vmem:[%s2843_s7 + $0x50] sm:$0xff] }
  0x54   :  { %v1507_v51 = vld [vmem:[%s2843_s7 + $0x40] sm:$0xff]  ;;  %v1508_v52 = vld [vmem:[%s2843_s7 + $0x48] sm:$0xff]  ;;  %v1510_v56 = vld [vmem:[%s2843_s7 + $0x58] sm:$0xff] }
  0x55   :  { %v1511_v58 = vld [vmem:[%s2843_s7 + $0x60] sm:$0xff]  ;;  %v1512_v59 = vld [vmem:[%s2843_s7 + $0x68] sm:$0xff] }
  0x56   :  { %687 = vperm.xlu0 %1955, %v637_v60  }
  0x57   :  { %692 = vperm.xlu1 %1956, %v638_v61   ;;  %v1513_v61 = vld [vmem:[%s2843_s7 + $0x70] sm:$0xff] }
  0x5a   :  { %777 = vperm.xlu0 %1955, %v655_v62   ;;  %v1514_v62 = vld [vmem:[%s2843_s7 + $0x78] sm:$0xff] }
  0x5b   :  { %782 = vperm.xlu1 %1956, %v656_v63  }
  0x5e   :  { %697 = vperm.xlu0 %1955, %v639_v0  }
  0x5f   :  { %702 = vperm.xlu1 %1956, %v640_v1  }
  0x62   :  { %787 = vperm.xlu0 %1955, %v657_v2  }
  0x63   :  { %792 = vperm.xlu1 %1956, %v658_v3  }
  0x66   :  { %707 = vperm.xlu0 %1955, %v641_v4  }
  0x67   :  { %712 = vperm.xlu1 %1956, %v642_v5  }
  0x6a   :  { %797 = vperm.xlu0 %1955, %v659_v6  }
  0x6b   :  { %802 = vperm.xlu1 %1956, %v660_v7  }
  0x6e   :  { %717 = vperm.xlu0 %1955, %v643_v8  }
  0x6f   :  { %722 = vperm.xlu1 %1956, %v644_v9  }
  0x72   :  { %807 = vperm.xlu0 %1955, %v661_v10  }
  0x73   :  { %812 = vperm.xlu1 %1956, %v662_v11  }
  0x76   :  { %727 = vperm.xlu0 %1955, %v645_v12  }
  0x77   :  { %732 = vperm.xlu1 %1956, %v646_v13  }
  0x7a   :  { %817 = vperm.xlu0 %1955, %v663_v14  }
  0x7b   :  { %822 = vperm.xlu1 %1956, %v664_v15  }
  0x7e   :  { %737 = vperm.xlu0 %1955, %v647_v16  }
  0x7f   :  { %742 = vperm.xlu1 %1956, %v648_v17  }
  0x81   :  { %v2452_v32 = vpop.permute.xlu0 %179 }
  0x82   :  { %1228 = vperm.xlu0 %1955, %v1210_v18   ;;  %v2454_v33 = vpop.permute.xlu1 %99 }
  0x83   :  { %1233 = vperm.xlu1 %1956, %v1211_v19  }
  0x85   :  { %v2462_v36 = vpop.permute.xlu0 %184 }
  0x86   :  { %1238 = vperm.xlu0 %1955, %v1212_v20   ;;  %v105_v39 = vpop.permute.xlu1 %104 }
  0x87   :  { %1243 = vperm.xlu1 %1956, %v1213_v21  }
  0x89   :  { %v2479_v43 = vpop.permute.xlu0 %189 }
  0x8a   :  { %1248 = vperm.xlu0 %1955, %v1214_v22   ;;  %v2481_v44 = vpop.permute.xlu1 %194 }
  0x8b   :  { %1253 = vperm.xlu1 %1956, %v1215_v23  }
  0x8d   :  { %v110_v47 = vpop.permute.xlu0 %109 }
  0x8e   :  { %1258 = vperm.xlu0 %1955, %v1216_v24   ;;  %v115_v50 = vpop.permute.xlu1 %114 }
  0x8f   :  { %1263 = vperm.xlu1 %1956, %v1217_v25  }
  0x91   :  { %v2501_v53 = vpop.permute.xlu0 %199 }
  0x92   :  { %1268 = vperm.xlu0 %1955, %v1218_v26   ;;  %v2503_v54 = vpop.permute.xlu1 %204 }
  0x93   :  { %1273 = vperm.xlu1 %1956, %v1219_v27  }
  0x95   :  { %v120_v57 = vpop.permute.xlu0 %119 }
  0x96   :  { %1278 = vperm.xlu0 %1955, %v1220_v28   ;;  %v125_v60 = vpop.permute.xlu1 %124 }
  0x97   :  { %1283 = vperm.xlu1 %1956, %v1221_v29  }
  0x99   :  { %v2523_v63 = vpop.permute.xlu0 %209 }
  0x9a   :  { %1288 = vperm.xlu0 %1955, %v1222_v30   ;;  %v2525_v0 = vpop.permute.xlu1 %214 }
  0x9b   :  { %1293 = vperm.xlu1 %1956, %v1223_v31  }
  0x9d   :  { %v130_v1 = vpop.permute.xlu0 %129 }
  0x9e   :  { %1298 = vperm.xlu0 %1955, %v1224_v34   ;;  %v135_v2 = vpop.permute.xlu1 %134 }
  0x9f   :  { %1303 = vperm.xlu1 %1956, %v1225_v35  }
  0xa1   :  { %v2527_v3 = vpop.permute.xlu0 %219 }
  0xa2   :  { %1517 = vperm.xlu0 %1955, %v1499_v37   ;;  %v2529_v4 = vpop.permute.xlu1 %224 }
  0xa3   :  { %1522 = vperm.xlu1 %1956, %v1500_v38  }
  0xa5   :  { %v140_v5 = vpop.permute.xlu0 %139 }
  0xa6   :  { %1527 = vperm.xlu0 %1955, %v1501_v41   ;;  %v145_v6 = vpop.permute.xlu1 %144 }
  0xa7   :  { %1532 = vperm.xlu1 %1956, %v1502_v42  }
  0xa9   :  { %v2531_v7 = vpop.permute.xlu0 %229 }
  0xaa   :  { %1537 = vperm.xlu0 %1955, %v1503_v45   ;;  %v2533_v8 = vpop.permute.xlu1 %234 }
  0xab   :  { %1542 = vperm.xlu1 %1956, %v1504_v46  }
  0xad   :  { %v150_v9 = vpop.permute.xlu0 %149 }
  0xae   :  { %1547 = vperm.xlu0 %1955, %v1505_v48   ;;  %v155_v13 = vpop.permute.xlu1 %154 }
  0xaf   :  { %1552 = vperm.xlu1 %1956, %v1506_v49  }
  0xb1   :  { %v2536_v21 = vpop.permute.xlu0 %239 }
  0xb2   :  { %1557 = vperm.xlu0 %1955, %v1507_v51   ;;  %v2540_v25 = vpop.permute.xlu1 %244 }
  0xb3   :  { %1562 = vperm.xlu1 %1956, %v1508_v52  }
  0xb5   :  { %v160_v34 = vpop.permute.xlu0 %159 }
  0xb6   :  { %1567 = vperm.xlu0 %1955, %v1509_v55   ;;  %v165_v40 = vpop.permute.xlu1 %164 }
  0xb7   :  { %1572 = vperm.xlu1 %1956, %v1510_v56  }
  0xba   :  { %1577 = vperm.xlu0 %1955, %v1511_v58   ;;  %v2550_v56 = vpop.permute.xlu1 %254 }
  0xbb   :  { %1582 = vperm.xlu1 %1956, %v1512_v59  }
  0xbe   :  { %1587 = vperm.xlu0 %1955, %v1513_v61  }
  0xbf   :  { %1592 = vperm.xlu1 %1956, %v1514_v62  }
  0xdb   :  { %v1921_v10 = vpop.f32.mrb[0].mxu0 }
  0xdc   :  { %v435_v11 = vadd.f32 %v1921_v10, %v110_v47  ;;  %v426_v12 = vpop.f32.mrb[1].mxu0 }
  0xdd   :  { %v1922_v14 = vpop.f32.mrb[2].mxu0  ;;  %v427_v15 = vadd.f32 %v426_v12, %v2454_v33 }
  0xde   :  { %v438_v16 = vadd.f32 %v1922_v14, %v115_v50  ;;  %v429_v17 = vpop.f32.mrb[3].mxu0  ;;  %v555_v18 = vmax.f32 %v435_v11, 0.0  ;;  %v2548_v50 = vpop.permute.xlu0 %249 }
  0xdf   :  { %v430_v20 = vadd.f32 %v429_v17, %v105_v39  ;;  %v553_v22 = vmax.f32 %v427_v15, 0.0  ;;  %v175_v14 = vpop.permute.xlu1 %174 }
  0xe0   :  { %v556_v19 = vmax.f32 %v438_v16, 0.0 }
  0xe1   :  { %v554_v24 = vmax.f32 %v430_v20, 0.0 }
  0xe2   :  { %v2538_v23 = vpack.c.bf16 %v556_v19, %v555_v18 }
  0xe3   :  { %v1925_v26 = vpop.f32.mrb[4].mxu0  ;;  %v2542_v29 = vpack.c.bf16 %v554_v24, %v553_v22 }
  0xe4   :  { %v451_v27 = vadd.f32 %v1925_v26, %v130_v1  ;;  %v442_v28 = vpop.f32.mrb[5].mxu0 }
  0xe5   :  { %v1926_v30 = vpop.f32.mrb[6].mxu0  ;;  %v443_v31 = vadd.f32 %v442_v28, %v120_v57 }
  0xe6   :  { %v454_v33 = vadd.f32 %v1926_v30, %v135_v2  ;;  %v445_v35 = vpop.f32.mrb[7].mxu0  ;;  %v559_v37 = vmax.f32 %v451_v27, 0.0  ;;  %v170_v2 = vpop.permute.xlu0 %169 }
  0xe7   :  { %v446_v39 = vadd.f32 %v445_v35, %v125_v60  ;;  %v557_v41 = vmax.f32 %v443_v31, 0.0 }
  0xe8   :  { %v560_v38 = vmax.f32 %v454_v33, 0.0 }
  0xe9   :  { %v558_v45 = vmax.f32 %v446_v39, 0.0 }
  0xea   :  { %v2544_v42 = vpack.c.bf16 %v560_v38, %v559_v37 }
  0xeb   :  { %v1929_v46 = vpop.f32.mrb[8].mxu0  ;;  %v2546_v47 = vpack.c.bf16 %v558_v45, %v557_v41 }
  0xec   :  { %v467_v48 = vadd.f32 %v1929_v46, %v150_v9  ;;  %v458_v49 = vpop.f32.mrb[9].mxu0 }
  0xed   :  { %v1930_v51 = vpop.f32.mrb[10].mxu0  ;;  %v459_v52 = vadd.f32 %v458_v49, %v140_v5 }
  0xee   :  { %v470_v55 = vadd.f32 %v1930_v51, %v155_v13  ;;  %v461_v57 = vpop.f32.mrb[11].mxu0  ;;  %v563_v58 = vmax.f32 %v467_v48, 0.0 }
  0xef   :  { %v462_v60 = vadd.f32 %v461_v57, %v145_v6  ;;  %v561_v61 = vmax.f32 %v459_v52, 0.0 }
  0xf0   :  { %v564_v59 = vmax.f32 %v470_v55, 0.0 }
  0xf1   :  { %v562_v1 = vmax.f32 %v462_v60, 0.0 }
  0xf2   :  { %v2552_v62 = vpack.c.bf16 %v564_v59, %v563_v58 }
  0xf3   :  { %v1933_v10 = vpop.f32.mrb[12].mxu0  ;;  %v2554_v11 = vpack.c.bf16 %v562_v1, %v561_v61 }
  0xf4   :  { %v483_v9 = vadd.f32 %v1933_v10, %v170_v2  ;;  %v474_v12 = vpop.f32.mrb[13].mxu0 }
  0xf5   :  { %v1934_v15 = vpop.f32.mrb[14].mxu0  ;;  %v475_v5 = vadd.f32 %v474_v12, %v160_v34 }
  0xf6   :  { %v486_v13 = vadd.f32 %v1934_v15, %v175_v14  ;;  %v477_v16 = vpop.f32.mrb[15].mxu0  ;;  %v567_v17 = vmax.f32 %v483_v9, 0.0 }
  0xf7   :  { %v478_v19 = vadd.f32 %v477_v16, %v165_v40  ;;  %v565_v20 = vmax.f32 %v475_v5, 0.0 }
  0xf8   :  { %v568_v18 = vmax.f32 %v486_v13, 0.0 }
  0xf9   :  { %v566_v22 = vmax.f32 %v478_v19, 0.0 }
  0xfa   :  { %v2556_v6 = vpack.c.bf16 %v568_v18, %v567_v17 }
  0xfb   :  { %v1937_v24 = vpop.f32.mrb[16].mxu0  ;;  %v2558_v26 = vpack.c.bf16 %v566_v22, %v565_v20  ;;  %v1985_v22 = vld [vmem:[%s2839_s3 + $0x30] ss:$8 sps:$4 sm:$0xff]  }
  0xfc   :  { %v499_v27 = vadd.f32 %v1937_v24, %v2479_v43  ;;  %v490_v28 = vpop.f32.mrb[17].mxu0  ;;  %v1986_v24 = vld [vmem:[%s2839_s3 + $0x44] ss:$8 sps:$4 sm:$0xff]  }
  0xfd   :  { %v1938_v30 = vpop.f32.mrb[18].mxu0  ;;  %v491_v31 = vadd.f32 %v490_v28, %v2452_v32  ;;  %v1991_v28 = vld [vmem:[%s2839_s3 + $0x50] ss:$8 sps:$4 sm:$0xff]  }
  0xfe   :  { %v502_v33 = vadd.f32 %v1938_v30, %v2481_v44  ;;  %v493_v34 = vpop.f32.mrb[19].mxu0  ;;  %v571_v35 = vmax.f32 %v499_v27, 0.0  ;;  %v1989_v27 = vld [vmem:[%s2839_s3 + $0x54] ss:$8 sps:$4 sm:$0xff]   ;;  %v1992_v30 = vld [vmem:[%s2839_s3 + $0x64] ss:$8 sps:$4 sm:$0xff]  }
  0xff   :  { %v494_v38 = vadd.f32 %v493_v34, %v2462_v36  ;;  %v569_v39 = vmax.f32 %v491_v31, 0.0  ;;  %v1994_v31 = vld [vmem:[%s2839_s3 + $0x60] ss:$8 sps:$4 sm:$0xff]   ;;  %v1997_v34 = vld [vmem:[%s2839_s3 + $0x70] ss:$8 sps:$4 sm:$0xff]  }
 0x100   :  { %v572_v37 = vmax.f32 %v502_v33, 0.0  ;;  %v1995_v33 = vld [vmem:[%s2839_s3 + $0x74] ss:$8 sps:$4 sm:$0xff]  }
 0x101   :  { %v570_v41 = vmax.f32 %v494_v38, 0.0  ;;  %v2001_v38 = vld [vmem:[%s2839_s3 + $0x94] ss:$8 sps:$4 sm:$0xff]  }
 0x102   :  { %v594_v40 = vpack.c.bf16 %v572_v37, %v571_v35  ;;  %v1998_v35 = vld [vmem:[%s2839_s3 + $0x84] ss:$8 sps:$4 sm:$0xff]   ;;  %v2000_v37 = vld [vmem:[%s2839_s3 + $0x80] ss:$8 sps:$4 sm:$0xff]  }
 0x103   :  { %v1941_v45 = vpop.f32.mrb[20].mxu0  ;;  %v593_v49 = vpack.c.bf16 %v570_v41, %v569_v39  ;;  %v2003_v39 = vld [vmem:[%s2839_s3 + $0x90] ss:$8 sps:$4 sm:$0xff]   ;;  %v2006_v41 = vld [vmem:[%s2839_s3 + $0xa0] ss:$8 sps:$4 sm:$0xff]  }
 0x104   :  { %v515_v46 = vadd.f32 %v1941_v45, %v2523_v63  ;;  %v506_v48 = vpop.f32.mrb[21].mxu0  ;;  %v2007_v45 = vld [vmem:[%s2839_s3 + $0xb4] ss:$8 sps:$4 sm:$0xff]  }
 0x105   :  { %v1942_v43 = vpop.f32.mrb[22].mxu0  ;;  %v507_v51 = vadd.f32 %v506_v48, %v2501_v53  ;;  %1741 = vmatprep.subr.bf16.mxu1 %v593_v49  ;;  %v2010_v48 = vld [vmem:[%s2839_s3 + $0xc4] ss:$8 sps:$4 sm:$0xff]   ;;  %v2012_v49 = vld [vmem:[%s2839_s3 + $0xc0] ss:$8 sps:$4 sm:$0xff]  }
 0x106   :  { %v518_v32 = vadd.f32 %v1942_v43, %v2525_v0  ;;  %v509_v44 = vpop.f32.mrb[23].mxu0  ;;  %1742 = vmatpush3.bf16.msra.mxu1 %v2542_v29  ;;  %v575_v52 = vmax.f32 %v515_v46, 0.0  ;;  %v2009_v46 = vld [vmem:[%s2839_s3 + $0xb0] ss:$8 sps:$4 sm:$0xff]   ;;  %v2013_v43 = vld [vmem:[%s2839_s3 + $0xd4] ss:$8 sps:$4 sm:$0xff]  }
 0x107   :  { %v510_v36 = vadd.f32 %v509_v44, %v2503_v54  ;;  %1743 = vmatprep.subr.bf16.mxu1 %v594_v40  ;;  %v573_v57 = vmax.f32 %v507_v51, 0.0  ;;  %v2004_v40 = vld [vmem:[%s2839_s3 + $0xa4] ss:$8 sps:$4 sm:$0xff]   ;;  %v2015_v51 = vld [vmem:[%s2839_s3 + $0xd0] ss:$8 sps:$4 sm:$0xff]  }
 0x108   :  { %v576_v55 = vmax.f32 %v518_v32, 0.0  ;;  %v2016_v32 = vld [vmem:[%s2839_s3 + $0xe4] ss:$8 sps:$4 sm:$0xff]   ;;  %v2018_v44 = vld [vmem:[%s2839_s3 + $0xe0] ss:$8 sps:$4 sm:$0xff]  }
 0x109   :  { %v574_v59 = vmax.f32 %v510_v36, 0.0  ;;  %v2677_v36 = vpop.permute.xlu0 %747 }
 0x10a   :  { %v596_v58 = vpack.c.bf16 %v576_v55, %v575_v52  ;;  %1744 = vmatpush3.bf16.msra.mxu1 %v2538_v23  ;;  %v2019_v52 = vld [vmem:[%s2839_s3 + $0xf4] ss:$8 sps:$4 sm:$0xff]   ;;  %v2021_v55 = vld [vmem:[%s2839_s3 + $0xf0] ss:$8 sps:$4 sm:$0xff]  }
 0x10b   :  { %v1945_v63 = vpop.f32.mrb[24].mxu0  ;;  %v595_v60 = vpack.c.bf16 %v574_v59, %v573_v57  ;;  %v2679_v57 = vpop.permute.xlu1 %752 }
 0x10c   :  { %v531_v53 = vadd.f32 %v1945_v63, %v2531_v7  ;;  %v522_v61 = vpop.f32.mrb[25].mxu0 }
 0x10d   :  { %v1946_v0 = vpop.f32.mrb[26].mxu0  ;;  %v523_v1 = vadd.f32 %v522_v61, %v2527_v3  ;;  %1745 = vmatprep.subr.bf16.mxu1 %v595_v60 }
 0x10e   :  { %v534_v29 = vadd.f32 %v1946_v0, %v2533_v8  ;;  %v525_v2 = vpop.f32.mrb[27].mxu0  ;;  %1746 = vmatpush3.bf16.msra.mxu1 %v2546_v47  ;;  %v579_v54 = vmax.f32 %v531_v53, 0.0 }
 0x10f   :  { %v526_v9 = vadd.f32 %v525_v2, %v2529_v4  ;;  %1747 = vmatprep.subr.bf16.mxu1 %v596_v58  ;;  %v577_v23 = vmax.f32 %v523_v1, 0.0  ;;  %v668_v58 = vpop.permute.xlu0 %667  ;;  %v673_v59 = vpop.permute.xlu1 %672 }
 0x110   :  { %v580_v10 = vmax.f32 %v534_v29, 0.0 }
 0x111   :  { %v578_v14 = vmax.f32 %v526_v9, 0.0 }
 0x112   :  { %v598_v12 = vpack.c.bf16 %v580_v10, %v579_v54  ;;  %1748 = vmatpush3.bf16.msra.mxu1 %v2544_v42 }
 0x113   :  { %v1949_v7 = vpop.f32.mrb[28].mxu0  ;;  %v597_v15 = vpack.c.bf16 %v578_v14, %v577_v23  ;;  %v2681_v63 = vpop.permute.xlu0 %757 }
 0x114   :  { %v547_v3 = vadd.f32 %v1949_v7, %v2548_v50  ;;  %v538_v5 = vpop.f32.mrb[29].mxu0  ;;  %v2683_v60 = vpop.permute.xlu1 %762 }
 0x115   :  { %v1950_v8 = vpop.f32.mrb[30].mxu0  ;;  %v539_v13 = vadd.f32 %v538_v5, %v2536_v21  ;;  %1749 = vmatprep.subr.bf16.mxu1 %v597_v15  ;;  %v1974_v21 = vld [vmem:[%s2839_s3] ss:$8 sps:$4 sm:$0xff]  }
 0x116   :  { %v550_v47 = vadd.f32 %v1950_v8, %v2550_v56  ;;  %v541_v16 = vpop.f32.mrb[31].mxu0  ;;  %1750 = vmatpush3.bf16.msra.mxu1 %v2554_v11  ;;  %v583_v4 = vmax.f32 %v547_v3, 0.0  ;;  %v1979_v56 = vld [vmem:[%s2839_s3 + $0x10] ss:$8 sps:$4 sm:$0xff]   ;;  %v1982_v11 = vld [vmem:[%s2839_s3 + $0x20] ss:$8 sps:$4 sm:$0xff]  }
 0x117   :  { %v542_v18 = vadd.f32 %v541_v16, %v2540_v25  ;;  %1751 = vmatprep.subr.bf16.mxu1 %v598_v12  ;;  %v581_v42 = vmax.f32 %v539_v13, 0.0  ;;  %v1977_v25 = vld [vmem:[%s2839_s3 + $0x14] ss:$8 sps:$4 sm:$0xff]   ;;  %v678_v53 = vpop.permute.xlu0 %677  ;;  %v2024_v3 = vld [vmem:[%s2841_s5 + $0x4] ss:$8 sps:$4 sm:$0xff]  }
 0x118   :  { %v584_v17 = vmax.f32 %v550_v47, 0.0  ;;  %v683_v61 = vpop.permute.xlu1 %682  ;;  %1418 = vmatprep.mubr.bf16.mxu0 %v2024_v3 }
 0x119   :  { %v582_v20 = vmax.f32 %v542_v18, 0.0 }
 0x11a   :  { %v600_v19 = vpack.c.bf16 %v584_v17, %v583_v4  ;;  %1752 = vmatpush3.bf16.msra.mxu1 %v2552_v62  ;;  %v1980_v62 = vld [vmem:[%s2839_s3 + $0x24] ss:$8 sps:$4 sm:$0xff]  }
 0x11b   :  { %v599_v50 = vpack.c.bf16 %v582_v20, %v581_v42  ;;  %v2685_v0 = vpop.permute.xlu0 %767 }
 0x11c   :  { %v2687_v1 = vpop.permute.xlu1 %772 }
 0x11d   :  { %1753 = vmatprep.subr.bf16.mxu1 %v599_v50 }
 0x11e   :  { %1754 = vmatpush3.bf16.msra.mxu1 %v2558_v26  ;;  %v1988_v26 = vld [vmem:[%s2839_s3 + $0x40] ss:$8 sps:$4 sm:$0xff]  }
 0x11f   :  { %1755 = vmatprep.subr.bf16.mxu1 %v600_v19  ;;  %v688_v29 = vpop.permute.xlu0 %687 }
 0x120   :  { %v693_v54 = vpop.permute.xlu1 %692 }
 0x122   :  { %1756 = vmatpush3.bf16.msra.mxu1 %v2556_v6  ;;  %v1983_v6 = vld [vmem:[%s2839_s3 + $0x34] ss:$8 sps:$4 sm:$0xff]  }
 0x123   :  { %v2689_v15 = vpop.permute.xlu0 %777 }
 0x124   :  { %v2694_v8 = vpop.permute.xlu1 %782 }
 0x125   :  { %1018 = vmatmul.mubr.bf16.vlgmr.msra.gmra.mrb[0].mxu1 %v1974_v21 }
 0x126   :  { %1025 = vmatprep.mubr.bf16.mxu1 %v1977_v25 }
 0x127   :  { %v698_v19 = vpop.permute.xlu0 %697 }
 0x128   :  { %v703_v25 = vpop.permute.xlu1 %702 }
 0x12d   :  { %1026 = vmatmul.mubr.bf16.gmra.mrb[4].mxu1 %v1979_v56 }
 0x12e   :  { %1033 = vmatprep.mubr.bf16.mxu1 %v1980_v62 }
 0x135   :  { %1034 = vmatmul.mubr.bf16.gmra.mrb[8].mxu1 %v1982_v11 }
 0x136   :  { %1041 = vmatprep.mubr.bf16.mxu1 %v1983_v6 }
 0x13d   :  { %1042 = vmatmul.mubr.bf16.gmra.mrb[12].mxu1 %v1985_v22  ;;  %v2698_v22 = vpop.permute.xlu0 %787 }
 0x13e   :  { %1049 = vmatprep.mubr.bf16.mxu1 %v1986_v24 }
 0x145   :  { %1050 = vmatmul.mubr.bf16.gmra.mrb[16].mxu1 %v1988_v26 }
 0x146   :  { %1057 = vmatprep.mubr.bf16.mxu1 %v1989_v27 }
 0x14d   :  { %1058 = vmatmul.mubr.bf16.gmra.mrb[20].mxu1 %v1991_v28 }
 0x14e   :  { %1065 = vmatprep.mubr.bf16.mxu1 %v1992_v30  ;;  %v2702_v30 = vpop.permute.xlu1 %792 }
 0x155   :  { %1066 = vmatmul.mubr.bf16.gmra.mrb[24].mxu1 %v1994_v31 }
 0x156   :  { %1073 = vmatprep.mubr.bf16.mxu1 %v1995_v33 }
 0x15d   :  { %1074 = vmatmul.mubr.bf16.gmra.mrb[28].mxu1 %v1997_v34 }
 0x15e   :  { %1081 = vmatprep.mubr.bf16.mxu1 %v1998_v35 }
 0x165   :  { %1082 = vmatmul.mubr.bf16.gmra.mrb[32].mxu1 %v2000_v37  ;;  %v708_v37 = vpop.permute.xlu0 %707 }
 0x166   :  { %1089 = vmatprep.mubr.bf16.mxu1 %v2001_v38 }
 0x16d   :  { %1090 = vmatmul.mubr.bf16.gmra.mrb[36].mxu1 %v2003_v39 }
 0x16e   :  { %1097 = vmatprep.mubr.bf16.mxu1 %v2004_v40 }
 0x175   :  { %1098 = vmatmul.mubr.bf16.gmra.mrb[40].mxu1 %v2006_v41  ;;  %v713_v41 = vpop.permute.xlu1 %712 }
 0x176   :  { %1105 = vmatprep.mubr.bf16.mxu1 %v2007_v45 }
 0x17d   :  { %1106 = vmatmul.mubr.bf16.gmra.mrb[44].mxu1 %v2009_v46 }
 0x17e   :  { %1113 = vmatprep.mubr.bf16.mxu1 %v2010_v48 }
 0x185   :  { %1114 = vmatmul.mubr.bf16.gmra.mrb[48].mxu1 %v2012_v49 }
 0x186   :  { %1121 = vmatprep.mubr.bf16.mxu1 %v2013_v43 }
 0x18d   :  { %1122 = vmatmul.mubr.bf16.gmra.mrb[52].mxu1 %v2015_v51 }
 0x18e   :  { %1129 = vmatprep.mubr.bf16.mxu1 %v2016_v32 }
 0x195   :  { %1130 = vmatmul.mubr.bf16.gmra.mrb[56].mxu1 %v2018_v44  ;;  %v2706_v44 = vpop.permute.xlu0 %797 }
 0x196   :  { %1137 = vmatprep.mubr.bf16.mxu1 %v2019_v52 }
 0x19d   :  { %1138 = vmatmul.mubr.bf16.gmra.mrb[60].mxu1 %v2021_v55  ;;  %v2708_v55 = vpop.permute.xlu1 %802 }
 0x1f8   :  { %v1757_v2 = vpop.f32.mrb[0].mxu1 }
 0x1f9   :  { %v1758_v10 = vpop.f32.mrb[1].mxu1 }
 0x1fa   :  { %v1759_v9 = vadd.f32 %v1758_v10, %v1757_v2  ;;  %v1760_v23 = vpop.f32.mrb[2].mxu1  ;;  %v718_v10 = vpop.permute.xlu0 %717 }
 0x1fb   :  { %v1761_v12 = vpop.f32.mrb[3].mxu1 }
 0x1fc   :  { %v1020_v14 = vadd.f32 %v1759_v9, %v668_v58  ;;  %v1762_v7 = vadd.f32 %v1761_v12, %v1760_v23 }
 0x1fe   :  { %v1023_v5 = vadd.f32 %v1762_v7, %v673_v59  ;;  %v1146_v13 = vmax.f32 %v1020_v14, 0.0  ;;  %v723_v14 = vpop.permute.xlu1 %722 }
 0x200   :  { %v1147_v47 = vmax.f32 %v1023_v5, 0.0  ;;  %v1763_v16 = vpop.f32.mrb[4].mxu1 }
 0x201   :  { %v1764_v4 = vpop.f32.mrb[5].mxu1 }
 0x202   :  { %v2696_v17 = vpack.c.bf16 %v1147_v47, %v1146_v13  ;;  %v1765_v18 = vadd.f32 %v1764_v4, %v1763_v16  ;;  %v1766_v42 = vpop.f32.mrb[6].mxu1  ;;  %v2712_v47 = vpop.permute.xlu0 %807 }
 0x203   :  { %v1767_v20 = vpop.f32.mrb[7].mxu1 }
 0x204   :  { %v1028_v50 = vadd.f32 %v1765_v18, %v678_v53  ;;  %v1768_v21 = vadd.f32 %v1767_v20, %v1766_v42 }
 0x206   :  { %v1031_v56 = vadd.f32 %v1768_v21, %v683_v61  ;;  %v1148_v62 = vmax.f32 %v1028_v50, 0.0 }
 0x208   :  { %v1149_v11 = vmax.f32 %v1031_v56, 0.0  ;;  %v1769_v6 = vpop.f32.mrb[8].mxu1  ;;  %v728_v56 = vpop.permute.xlu0 %727 }
 0x209   :  { %v1770_v24 = vpop.f32.mrb[9].mxu1 }
 0x20a   :  { %v2700_v26 = vpack.c.bf16 %v1149_v11, %v1148_v62  ;;  %v1771_v27 = vadd.f32 %v1770_v24, %v1769_v6  ;;  %v1772_v28 = vpop.f32.mrb[10].mxu1 }
 0x20b   :  { %v1773_v31 = vpop.f32.mrb[11].mxu1 }
 0x20c   :  { %v1036_v33 = vadd.f32 %v1771_v27, %v688_v29  ;;  %v1774_v34 = vadd.f32 %v1773_v31, %v1772_v28 }
 0x20e   :  { %v1039_v35 = vadd.f32 %v1774_v34, %v693_v54  ;;  %v1150_v38 = vmax.f32 %v1036_v33, 0.0 }
 0x210   :  { %v1151_v39 = vmax.f32 %v1039_v35, 0.0  ;;  %v1775_v40 = vpop.f32.mrb[12].mxu1 }
 0x211   :  { %v1776_v45 = vpop.f32.mrb[13].mxu1 }
 0x212   :  { %v2704_v46 = vpack.c.bf16 %v1151_v39, %v1150_v38  ;;  %v1777_v48 = vadd.f32 %v1776_v45, %v1775_v40  ;;  %v1778_v49 = vpop.f32.mrb[14].mxu1  ;;  %v2720_v38 = vpop.permute.xlu0 %817 }
 0x213   :  { %v1779_v43 = vpop.f32.mrb[15].mxu1 }
 0x214   :  { %v1044_v51 = vadd.f32 %v1777_v48, %v698_v19  ;;  %v1780_v32 = vadd.f32 %v1779_v43, %v1778_v49  ;;  %v2716_v19 = vpop.permute.xlu1 %812 }
 0x216   :  { %v1047_v52 = vadd.f32 %v1780_v32, %v703_v25  ;;  %v1152_v58 = vmax.f32 %v1044_v51, 0.0 }
 0x218   :  { %v1153_v59 = vmax.f32 %v1047_v52, 0.0  ;;  %v1781_v53 = vpop.f32.mrb[16].mxu1  ;;  %v733_v24 = vpop.permute.xlu1 %732 }
 0x219   :  { %v1782_v61 = vpop.f32.mrb[17].mxu1  ;;  %v738_v52 = vpop.permute.xlu0 %737 }
 0x21a   :  { %v2710_v29 = vpack.c.bf16 %v1153_v59, %v1152_v58  ;;  %v1783_v2 = vadd.f32 %v1782_v61, %v1781_v53  ;;  %v1784_v54 = vpop.f32.mrb[18].mxu1 }
 0x21b   :  { %v1785_v9 = vpop.f32.mrb[19].mxu1 }
 0x21c   :  { %v1052_v23 = vadd.f32 %v1783_v2, %v708_v37  ;;  %v1786_v12 = vadd.f32 %v1785_v9, %v1784_v54  ;;  %v2722_v40 = vpop.permute.xlu1 %822 }
 0x21e   :  { %v1055_v7 = vadd.f32 %v1786_v12, %v713_v41  ;;  %v1154_v3 = vmax.f32 %v1052_v23, 0.0 }
 0x220   :  { %v1155_v5 = vmax.f32 %v1055_v7, 0.0  ;;  %v1787_v13 = vpop.f32.mrb[20].mxu1  ;;  %v743_v61 = vpop.permute.xlu1 %742 }
 0x221   :  { %v1788_v16 = vpop.f32.mrb[21].mxu1 }
 0x222   :  { %v2714_v4 = vpack.c.bf16 %v1155_v5, %v1154_v3  ;;  %v1789_v18 = vadd.f32 %v1788_v16, %v1787_v13  ;;  %v1790_v42 = vpop.f32.mrb[22].mxu1 }
 0x223   :  { %v1791_v20 = vpop.f32.mrb[23].mxu1 }
 0x224   :  { %v1060_v50 = vadd.f32 %v1789_v18, %v718_v10  ;;  %v1792_v21 = vadd.f32 %v1791_v20, %v1790_v42 }
 0x226   :  { %v1063_v25 = vadd.f32 %v1792_v21, %v723_v14  ;;  %v1156_v62 = vmax.f32 %v1060_v50, 0.0 }
 0x228   :  { %v1157_v11 = vmax.f32 %v1063_v25, 0.0  ;;  %v1793_v6 = vpop.f32.mrb[24].mxu1 }
 0x229   :  { %v1794_v27 = vpop.f32.mrb[25].mxu1 }
 0x22a   :  { %v2718_v28 = vpack.c.bf16 %v1157_v11, %v1156_v62  ;;  %v1795_v31 = vadd.f32 %v1794_v27, %v1793_v6  ;;  %v1796_v33 = vpop.f32.mrb[26].mxu1 }
 0x22b   :  { %v1797_v34 = vpop.f32.mrb[27].mxu1 }
 0x22c   :  { %v1068_v35 = vadd.f32 %v1795_v31, %v728_v56  ;;  %v1798_v37 = vadd.f32 %v1797_v34, %v1796_v33 }
 0x22e   :  { %v1071_v39 = vadd.f32 %v1798_v37, %v733_v24  ;;  %v1158_v41 = vmax.f32 %v1068_v35, 0.0 }
 0x230   :  { %v1159_v45 = vmax.f32 %v1071_v39, 0.0  ;;  %v1799_v48 = vpop.f32.mrb[28].mxu1 }
 0x231   :  { %v1800_v49 = vpop.f32.mrb[29].mxu1 }
 0x232   :  { %v2724_v43 = vpack.c.bf16 %v1159_v45, %v1158_v41  ;;  %v1801_v51 = vadd.f32 %v1800_v49, %v1799_v48  ;;  %v1802_v32 = vpop.f32.mrb[30].mxu1 }
 0x233   :  { %v1803_v58 = vpop.f32.mrb[31].mxu1 }
 0x234   :  { %v1076_v59 = vadd.f32 %v1801_v51, %v738_v52  ;;  %v1804_v53 = vadd.f32 %v1803_v58, %v1802_v32 }
 0x236   :  { %v1079_v2 = vadd.f32 %v1804_v53, %v743_v61  ;;  %v1160_v54 = vmax.f32 %v1076_v59, 0.0 }
 0x238   :  { %v1161_v10 = vmax.f32 %v1079_v2, 0.0  ;;  %v1805_v9 = vpop.f32.mrb[32].mxu1 }
 0x239   :  { %v1806_v23 = vpop.f32.mrb[33].mxu1 }
 0x23a   :  { %v2726_v12 = vpack.c.bf16 %v1161_v10, %v1160_v54  ;;  %v1807_v14 = vadd.f32 %v1806_v23, %v1805_v9  ;;  %v1808_v7 = vpop.f32.mrb[34].mxu1 }
 0x23b   :  { %v1809_v3 = vpop.f32.mrb[35].mxu1 }
 0x23c   :  { %v1084_v5 = vadd.f32 %v1807_v14, %v2677_v36  ;;  %v1810_v13 = vadd.f32 %v1809_v3, %v1808_v7 }
 0x23e   :  { %v1087_v16 = vadd.f32 %v1810_v13, %v2679_v57  ;;  %v1162_v18 = vmax.f32 %v1084_v5, 0.0 }
 0x240   :  { %v1163_v42 = vmax.f32 %v1087_v16, 0.0  ;;  %v1811_v20 = vpop.f32.mrb[36].mxu1 }
 0x241   :  { %v1812_v50 = vpop.f32.mrb[37].mxu1 }
 0x242   :  { %v1813_v21 = vadd.f32 %v1812_v50, %v1811_v20  ;;  %v1814_v25 = vpop.f32.mrb[38].mxu1  ;;  %v1186_v56 = vpack.c.bf16 %v1163_v42, %v1162_v18 }
 0x243   :  { %v1815_v62 = vpop.f32.mrb[39].mxu1 }
 0x244   :  { %v1092_v11 = vadd.f32 %v1813_v21, %v2681_v63  ;;  %v1816_v6 = vadd.f32 %v1815_v62, %v1814_v25  ;;  %1853 = vmatprep.subr.bf16.mxu0 %v1186_v56 }
 0x245   :  { %1854 = vmatpush3.bf16.msra.mxu0 %v2696_v17 }
 0x246   :  { %v1095_v24 = vadd.f32 %v1816_v6, %v2683_v60  ;;  %v1164_v36 = vmax.f32 %v1092_v11, 0.0 }
 0x248   :  { %v1165_v27 = vmax.f32 %v1095_v24, 0.0  ;;  %v1817_v31 = vpop.f32.mrb[40].mxu1 }
 0x249   :  { %v1818_v57 = vpop.f32.mrb[41].mxu1 }
 0x24a   :  { %v1819_v33 = vadd.f32 %v1818_v57, %v1817_v31  ;;  %v1820_v34 = vpop.f32.mrb[42].mxu1  ;;  %v1187_v35 = vpack.c.bf16 %v1165_v27, %v1164_v36 }
 0x24b   :  { %v1821_v37 = vpop.f32.mrb[43].mxu1 }
 0x24c   :  { %v1100_v39 = vadd.f32 %v1819_v33, %v2685_v0  ;;  %v1822_v41 = vadd.f32 %v1821_v37, %v1820_v34  ;;  %1855 = vmatprep.subr.bf16.mxu0 %v1187_v35 }
 0x24d   :  { %1856 = vmatpush3.bf16.msra.mxu0 %v2700_v26 }
 0x24e   :  { %v1103_v63 = vadd.f32 %v1822_v41, %v2687_v1  ;;  %v1166_v45 = vmax.f32 %v1100_v39, 0.0 }
 0x250   :  { %v1167_v17 = vmax.f32 %v1103_v63, 0.0  ;;  %v1823_v48 = vpop.f32.mrb[44].mxu1  ;;  %v2031_v63 = vld [vmem:[%s2841_s5 + $0x34] ss:$8 sps:$4 sm:$0xff]  }
 0x251   :  { %v1824_v60 = vpop.f32.mrb[45].mxu1 }
 0x252   :  { %v1825_v49 = vadd.f32 %v1824_v60, %v1823_v48  ;;  %v1826_v51 = vpop.f32.mrb[46].mxu1  ;;  %v1188_v32 = vpack.c.bf16 %v1167_v17, %v1166_v45  ;;  %v2033_v45 = vld [vmem:[%s2841_s5 + $0x30] ss:$8 sps:$4 sm:$0xff]   ;;  %v2034_v17 = vld [vmem:[%s2841_s5 + $0x44] ss:$8 sps:$4 sm:$0xff]  }
 0x253   :  { %v1827_v52 = vpop.f32.mrb[47].mxu1  ;;  %v2036_v48 = vld [vmem:[%s2841_s5 + $0x40] ss:$8 sps:$4 sm:$0xff]   ;;  %v2037_v60 = vld [vmem:[%s2841_s5 + $0x54] ss:$8 sps:$4 sm:$0xff]  }
 0x254   :  { %v1108_v58 = vadd.f32 %v1825_v49, %v2689_v15  ;;  %v1828_v59 = vadd.f32 %v1827_v52, %v1826_v51  ;;  %1857 = vmatprep.subr.bf16.mxu0 %v1188_v32  ;;  %v2039_v49 = vld [vmem:[%s2841_s5 + $0x50] ss:$8 sps:$4 sm:$0xff]   ;;  %v2040_v51 = vld [vmem:[%s2841_s5 + $0x64] ss:$8 sps:$4 sm:$0xff]   ;;  %v2042_v32 = vld [vmem:[%s2841_s5 + $0x60] ss:$8 sps:$4 sm:$0xff]  }
 0x255   :  { %1858 = vmatpush3.bf16.msra.mxu0 %v2704_v46  ;;  %v2043_v52 = vld [vmem:[%s2841_s5 + $0x74] ss:$8 sps:$4 sm:$0xff]  }
 0x256   :  { %v1111_v0 = vadd.f32 %v1828_v59, %v2694_v8  ;;  %v1168_v53 = vmax.f32 %v1108_v58, 0.0  ;;  %v2045_v58 = vld [vmem:[%s2841_s5 + $0x70] ss:$8 sps:$4 sm:$0xff]   ;;  %v1229_v59 = vpop.permute.xlu0 %1228 }
 0x258   :  { %v1169_v26 = vmax.f32 %v1111_v0, 0.0  ;;  %v1829_v61 = vpop.f32.mrb[48].mxu1  ;;  %v1234_v0 = vpop.permute.xlu1 %1233 }
 0x259   :  { %v1830_v1 = vpop.f32.mrb[49].mxu1 }
 0x25a   :  { %v1831_v2 = vadd.f32 %v1830_v1, %v1829_v61  ;;  %v1832_v54 = vpop.f32.mrb[50].mxu1  ;;  %v1189_v10 = vpack.c.bf16 %v1169_v26, %v1168_v53  ;;  %v1239_v53 = vpop.permute.xlu0 %1238 }
 0x25b   :  { %v1833_v9 = vpop.f32.mrb[51].mxu1 }
 0x25c   :  { %v1116_v23 = vadd.f32 %v1831_v2, %v2698_v22  ;;  %v1834_v14 = vadd.f32 %v1833_v9, %v1832_v54  ;;  %1859 = vmatprep.subr.bf16.mxu0 %v1189_v10  ;;  %v1244_v26 = vpop.permute.xlu1 %1243 }
 0x25d   :  { %1860 = vmatpush3.bf16.msra.mxu0 %v2710_v29 }
 0x25e   :  { %v1119_v15 = vadd.f32 %v1834_v14, %v2702_v30  ;;  %v1170_v7 = vmax.f32 %v1116_v23, 0.0  ;;  %v1249_v61 = vpop.permute.xlu0 %1248 }
 0x260   :  { %v1171_v46 = vmax.f32 %v1119_v15, 0.0  ;;  %v1835_v3 = vpop.f32.mrb[52].mxu1  ;;  %v1254_v1 = vpop.permute.xlu1 %1253 }
 0x261   :  { %v1836_v8 = vpop.f32.mrb[53].mxu1 }
 0x262   :  { %v1837_v5 = vadd.f32 %v1836_v8, %v1835_v3  ;;  %v1838_v13 = vpop.f32.mrb[54].mxu1  ;;  %v1190_v16 = vpack.c.bf16 %v1171_v46, %v1170_v7  ;;  %v1259_v2 = vpop.permute.xlu0 %1258 }
 0x263   :  { %v1839_v18 = vpop.f32.mrb[55].mxu1 }
 0x264   :  { %v1124_v42 = vadd.f32 %v1837_v5, %v2706_v44  ;;  %v1840_v20 = vadd.f32 %v1839_v18, %v1838_v13  ;;  %1861 = vmatprep.subr.bf16.mxu0 %v1190_v16  ;;  %v2797_v54 = vpop.permute.xlu1 %1263 }
 0x265   :  { %1862 = vmatpush3.bf16.msra.mxu0 %v2714_v4 }
 0x266   :  { %v1127_v22 = vadd.f32 %v1840_v20, %v2708_v55  ;;  %v1172_v50 = vmax.f32 %v1124_v42, 0.0  ;;  %v2799_v10 = vpop.permute.xlu0 %1268 }
 0x268   :  { %v1173_v29 = vmax.f32 %v1127_v22, 0.0  ;;  %v1841_v21 = vpop.f32.mrb[56].mxu1  ;;  %v2801_v9 = vpop.permute.xlu1 %1273 }
 0x269   :  { %v1842_v30 = vpop.f32.mrb[57].mxu1 }
 0x26a   :  { %v1843_v25 = vadd.f32 %v1842_v30, %v1841_v21  ;;  %v1844_v56 = vpop.f32.mrb[58].mxu1  ;;  %v1191_v62 = vpack.c.bf16 %v1173_v29, %v1172_v50  ;;  %v2803_v23 = vpop.permute.xlu0 %1278 }
 0x26b   :  { %v1845_v11 = vpop.f32.mrb[59].mxu1 }
 0x26c   :  { %v1132_v6 = vadd.f32 %v1843_v25, %v2712_v47  ;;  %v1846_v24 = vadd.f32 %v1845_v11, %v1844_v56  ;;  %1863 = vmatprep.subr.bf16.mxu0 %v1191_v62  ;;  %v2805_v14 = vpop.permute.xlu1 %1283 }
 0x26d   :  { %1864 = vmatpush3.bf16.msra.mxu0 %v2718_v28 }
 0x26e   :  { %v1135_v44 = vadd.f32 %v1846_v24, %v2716_v19  ;;  %v1174_v36 = vmax.f32 %v1132_v6, 0.0  ;;  %v2022_v19 = vld [vmem:[%s2841_s5] ss:$8 sps:$4 sm:$0xff]   ;;  %v2807_v5 = vpop.permute.xlu0 %1288 }
 0x270   :  { %v1175_v4 = vmax.f32 %v1135_v44, 0.0  ;;  %v1847_v27 = vpop.f32.mrb[60].mxu1  ;;  %v2809_v18 = vpop.permute.xlu1 %1293 }
 0x271   :  { %v1848_v55 = vpop.f32.mrb[61].mxu1 }
 0x272   :  { %v1849_v31 = vadd.f32 %v1848_v55, %v1847_v27  ;;  %v1850_v57 = vpop.f32.mrb[62].mxu1  ;;  %v1192_v33 = vpack.c.bf16 %v1175_v4, %v1174_v36  ;;  %v2811_v50 = vpop.permute.xlu0 %1298 }
 0x273   :  { %v1851_v34 = vpop.f32.mrb[63].mxu1 }
 0x274   :  { %v1140_v35 = vadd.f32 %v1849_v31, %v2720_v38  ;;  %v1852_v37 = vadd.f32 %v1851_v34, %v1850_v57  ;;  %1865 = vmatprep.subr.bf16.mxu0 %v1192_v33  ;;  %v2025_v38 = vld [vmem:[%s2841_s5 + $0x14] ss:$8 sps:$4 sm:$0xff]   ;;  %v2813_v25 = vpop.permute.xlu1 %1303 }
 0x275   :  { %1866 = vmatpush3.bf16.msra.mxu0 %v2724_v43  ;;  %v2028_v43 = vld [vmem:[%s2841_s5 + $0x24] ss:$8 sps:$4 sm:$0xff]  }
 0x276   :  { %v1143_v47 = vadd.f32 %v1852_v37, %v2722_v40  ;;  %v1176_v39 = vmax.f32 %v1140_v35, 0.0  ;;  %v2027_v40 = vld [vmem:[%s2841_s5 + $0x10] ss:$8 sps:$4 sm:$0xff]   ;;  %v1518_v24 = vpop.permute.xlu0 %1517 }
 0x278   :  { %v1177_v28 = vmax.f32 %v1143_v47, 0.0  ;;  %v1523_v55 = vpop.permute.xlu1 %1522 }
 0x27a   :  { %v1193_v41 = vpack.c.bf16 %v1177_v28, %v1176_v39  ;;  %v1528_v28 = vpop.permute.xlu0 %1527 }
 0x27c   :  { %1867 = vmatprep.subr.bf16.mxu0 %v1193_v41 }
 0x27d   :  { %1868 = vmatpush3.bf16.msra.mxu0 %v2726_v12  ;;  %v2030_v12 = vld [vmem:[%s2841_s5 + $0x20] ss:$8 sps:$4 sm:$0xff]   ;;  %s2103_s5 = smov [#allocation2]  }
 0x27e   :  { %s1632_s16 = sshll.u32 %s2103_s5, 4  ;;  %s1633_s16 = int_to_ptr.vmem [resolvable:$true] %s1632_s16 }
 0x27f   :  { %s2078_s17 = scalar_lea.vmem %s1633_s16, 2048  ;;  %p2083_p1 = scmp.lt.s32.totalorder %s1633_s16, %s1633_s16 }
 0x280   :  { %1419 = vmatmul.mubr.bf16.vlgmr.msra.gmra.mrb[32].mxu0 %v2022_v19  ;;  %p2079_p0 = scmp.ne.s32.totalorder %s1633_s16, %s2078_s17  ;;  %p2084_p2 = scmp.lt.s32.totalorder %s2078_s17, %s2078_s17 }
 0x281   :  { %1426 = vmatprep.mubr.bf16.mxu0 %v2025_v38 }
 0x282   :  { %p2085_p3 = por %p2084_p2, %p2083_p1 }
 0x284   :  { %p2086_p4 = pnand %p2085_p3, %p2079_p0 }
 0x288   :  { %1427 = vmatmul.mubr.bf16.gmra.mrb[36].mxu0 %v2027_v40 }
 0x289   :  { %1434 = vmatprep.mubr.bf16.mxu0 %v2028_v43  ;;  %v1533_v43 = vpop.permute.xlu1 %1532 }
 0x290   :  { %1435 = vmatmul.mubr.bf16.gmra.mrb[40].mxu0 %v2030_v12 }
 0x291   :  { %1442 = vmatprep.mubr.bf16.mxu0 %v2031_v63 }
 0x298   :  { %1443 = vmatmul.mubr.bf16.gmra.mrb[44].mxu0 %v2033_v45 }
 0x299   :  { %1450 = vmatprep.mubr.bf16.mxu0 %v2034_v17 }
 0x2a0   :  { %1451 = vmatmul.mubr.bf16.gmra.mrb[48].mxu0 %v2036_v48 }
 0x2a1   :  { %1458 = vmatprep.mubr.bf16.mxu0 %v2037_v60 }
 0x2a8   :  { %1459 = vmatmul.mubr.bf16.gmra.mrb[52].mxu0 %v2039_v49 }
 0x2a9   :  { %1466 = vmatprep.mubr.bf16.mxu0 %v2040_v51 }
 0x2b0   :  { %1467 = vmatmul.mubr.bf16.gmra.mrb[56].mxu0 %v2042_v32  ;;  %v1538_v32 = vpop.permute.xlu0 %1537 }
 0x2b1   :  { %1474 = vmatprep.mubr.bf16.mxu0 %v2043_v52 }
 0x2b8   :  { %1475 = vmatmul.mubr.bf16.gmra.mrb[60].mxu0 %v2045_v58 }
 0x353   :  { %v1869_v15 = vpop.f32.mrb[32].mxu0 }
 0x354   :  { %v1870_v7 = vpop.f32.mrb[33].mxu0 }
 0x355   :  { %v1871_v46 = vadd.f32 %v1870_v7, %v1869_v15  ;;  %v1872_v3 = vpop.f32.mrb[34].mxu0 }
 0x356   :  { %v1873_v8 = vpop.f32.mrb[35].mxu0 }
 0x357   :  { %v1421_v13 = vadd.f32 %v1871_v46, %v1229_v59  ;;  %v1874_v16 = vadd.f32 %v1873_v8, %v1872_v3  ;;  %v1548_v3 = vpop.permute.xlu0 %1547 }
 0x359   :  { %2046 = vtanh.f32 %v1421_v13  ;;  %v1424_v42 = vadd.f32 %v1874_v16, %v1234_v0 }
 0x35b   :  { %2048 = vtanh.f32 %v1424_v42  ;;  %v1875_v20 = vpop.f32.mrb[36].mxu0 }
 0x35c   :  { %v1876_v22 = vpop.f32.mrb[37].mxu0 }
 0x35d   :  { %v1877_v29 = vadd.f32 %v1876_v22, %v1875_v20  ;;  %v1878_v21 = vpop.f32.mrb[38].mxu0 }
 0x35e   :  { %v1879_v30 = vpop.f32.mrb[39].mxu0 }
 0x35f   :  { %v1429_v56 = vadd.f32 %v1877_v29, %v1239_v53  ;;  %v1880_v62 = vadd.f32 %v1879_v30, %v1878_v21  ;;  %v1543_v53 = vpop.permute.xlu1 %1542 }
 0x361   :  { %2050 = vtanh.f32 %v1429_v56  ;;  %v1432_v11 = vadd.f32 %v1880_v62, %v1244_v26 }
 0x363   :  { %v2047_v6 = vpop.eup %2046  ;;  %2052 = vtanh.f32 %v1432_v11  ;;  %v1881_v44 = vpop.f32.mrb[40].mxu0 }
 0x364   :  { %v1595_v36 = vmul.f32 %v2047_v6, %v1518_v24  ;;  %v1882_v4 = vpop.f32.mrb[41].mxu0  ;;  %v1553_v20 = vpop.permute.xlu1 %1552 }
 0x365   :  { %v2049_v27 = vpop.eup %2048  ;;  %v1883_v31 = vadd.f32 %v1882_v4, %v1881_v44  ;;  %v1884_v57 = vpop.f32.mrb[42].mxu0 }
 0x366   :  { %1611 = vst [vmem:[#allocation2] sm:$0xff] %v1595_v36  ;;  %v1596_v33 = vmul.f32 %v2049_v27, %v1523_v55  ;;  %v1885_v34 = vpop.f32.mrb[43].mxu0  ;;  %v1558_v11 = vpop.permute.xlu0 %1557 }
 0x367   :  { %v1437_v35 = vadd.f32 %v1883_v31, %v1249_v61  ;;  %v1886_v37 = vadd.f32 %v1885_v34, %v1884_v57 }
 0x368   :  { %1612 = vst [vmem:[#allocation2 + $0x8] sm:$0xff] %v1596_v33  ;;  %v1563_v4 = vpop.permute.xlu1 %1562 }
 0x369   :  { %2054 = vtanh.f32 %v1437_v35  ;;  %v1440_v47 = vadd.f32 %v1886_v37, %v1254_v1 }
 0x36a   :  { %v1568_v35 = vpop.permute.xlu0 %1567 }
 0x36b   :  { %v2051_v39 = vpop.eup %2050  ;;  %2056 = vtanh.f32 %v1440_v47  ;;  %v1887_v41 = vpop.f32.mrb[44].mxu0 }
 0x36c   :  { %v1597_v19 = vmul.f32 %v2051_v39, %v1528_v28  ;;  %v1888_v38 = vpop.f32.mrb[45].mxu0 }
 0x36d   :  { %v2053_v40 = vpop.eup %2052  ;;  %v1889_v12 = vadd.f32 %v1888_v38, %v1887_v41  ;;  %v1890_v63 = vpop.f32.mrb[46].mxu0 }
 0x36e   :  { %1613 = vst [vmem:[#allocation2 + $0x10] sm:$0xff] %v1597_v19  ;;  %v1598_v45 = vmul.f32 %v2053_v40, %v1533_v43  ;;  %v1891_v17 = vpop.f32.mrb[47].mxu0  ;;  %v1573_v41 = vpop.permute.xlu1 %1572 }
 0x36f   :  { %v1445_v48 = vadd.f32 %v1889_v12, %v1259_v2  ;;  %v1892_v60 = vadd.f32 %v1891_v17, %v1890_v63 }
 0x370   :  { %1614 = vst [vmem:[#allocation2 + $0x18] sm:$0xff] %v1598_v45  ;;  %v1578_v45 = vpop.permute.xlu0 %1577 }
 0x371   :  { %2058 = vtanh.f32 %v1445_v48  ;;  %v1448_v49 = vadd.f32 %v1892_v60, %v2797_v54 }
 0x372   :  { %v1583_v60 = vpop.permute.xlu1 %1582 }
 0x373   :  { %v2055_v51 = vpop.eup %2054  ;;  %2060 = vtanh.f32 %v1448_v49  ;;  %v1893_v52 = vpop.f32.mrb[48].mxu0 }
 0x374   :  { %v1599_v58 = vmul.f32 %v2055_v51, %v1538_v32  ;;  %v1894_v59 = vpop.f32.mrb[49].mxu0  ;;  %v1588_v32 = vpop.permute.xlu0 %1587 }
 0x375   :  { %v2057_v0 = vpop.eup %2056  ;;  %v1895_v26 = vadd.f32 %v1894_v59, %v1893_v52  ;;  %v1896_v61 = vpop.f32.mrb[50].mxu0 }
 0x376   :  { %1615 = vst [vmem:[#allocation2 + $0x20] sm:$0xff] %v1599_v58  ;;  %v1600_v1 = vmul.f32 %v2057_v0, %v1543_v53  ;;  %v1897_v15 = vpop.f32.mrb[51].mxu0  ;;  %v1593_v58 = vpop.permute.xlu1 %1592 }
 0x377   :  { %v1453_v2 = vadd.f32 %v1895_v26, %v2799_v10  ;;  %v1898_v7 = vadd.f32 %v1897_v15, %v1896_v61 }
 0x378   :  { %1616 = vst [vmem:[#allocation2 + $0x28] sm:$0xff] %v1600_v1 }
 0x379   :  { %2062 = vtanh.f32 %v1453_v2  ;;  %v1456_v54 = vadd.f32 %v1898_v7, %v2801_v9 }
 0x37b   :  { %v2059_v46 = vpop.eup %2058  ;;  %2064 = vtanh.f32 %v1456_v54  ;;  %v1899_v8 = vpop.f32.mrb[52].mxu0 }
 0x37c   :  { %v1601_v13 = vmul.f32 %v2059_v46, %v1548_v3  ;;  %v1900_v16 = vpop.f32.mrb[53].mxu0 }
 0x37d   :  { %v2061_v42 = vpop.eup %2060  ;;  %v1901_v22 = vadd.f32 %v1900_v16, %v1899_v8  ;;  %v1902_v29 = vpop.f32.mrb[54].mxu0 }
 0x37e   :  { %1617 = vst [vmem:[#allocation2 + $0x30] sm:$0xff] %v1601_v13  ;;  %v1602_v21 = vmul.f32 %v2061_v42, %v1553_v20  ;;  %v1903_v30 = vpop.f32.mrb[55].mxu0 }
 0x37f   :  { %v1461_v10 = vadd.f32 %v1901_v22, %v2803_v23  ;;  %v1904_v56 = vadd.f32 %v1903_v30, %v1902_v29 }
 0x380   :  { %1618 = vst [vmem:[#allocation2 + $0x38] sm:$0xff] %v1602_v21 }
 0x381   :  { %2066 = vtanh.f32 %v1461_v10  ;;  %v1464_v9 = vadd.f32 %v1904_v56, %v2805_v14 }
 0x383   :  { %v2063_v62 = vpop.eup %2062  ;;  %2068 = vtanh.f32 %v1464_v9  ;;  %v1905_v6 = vpop.f32.mrb[56].mxu0 }
 0x384   :  { %v1603_v24 = vmul.f32 %v2063_v62, %v1558_v11  ;;  %v1906_v44 = vpop.f32.mrb[57].mxu0 }
 0x385   :  { %v2065_v36 = vpop.eup %2064  ;;  %v1907_v27 = vadd.f32 %v1906_v44, %v1905_v6  ;;  %v1908_v55 = vpop.f32.mrb[58].mxu0 }
 0x386   :  { %1619 = vst [vmem:[#allocation2 + $0x40] sm:$0xff] %v1603_v24  ;;  %v1604_v31 = vmul.f32 %v2065_v36, %v1563_v4  ;;  %v1909_v57 = vpop.f32.mrb[59].mxu0 }
 0x387   :  { %v1469_v23 = vadd.f32 %v1907_v27, %v2807_v5  ;;  %v1910_v33 = vadd.f32 %v1909_v57, %v1908_v55 }
 0x388   :  { %1620 = vst [vmem:[#allocation2 + $0x48] sm:$0xff] %v1604_v31 }
 0x389   :  { %2070 = vtanh.f32 %v1469_v23  ;;  %v1472_v14 = vadd.f32 %v1910_v33, %v2809_v18 }
 0x38b   :  { %v2067_v34 = vpop.eup %2066  ;;  %2072 = vtanh.f32 %v1472_v14  ;;  %v1911_v37 = vpop.f32.mrb[60].mxu0 }
 0x38c   :  { %v1605_v47 = vmul.f32 %v2067_v34, %v1568_v35  ;;  %v1912_v39 = vpop.f32.mrb[61].mxu0 }
 0x38d   :  { %v2069_v28 = vpop.eup %2068  ;;  %v1913_v19 = vadd.f32 %v1912_v39, %v1911_v37  ;;  %v1914_v38 = vpop.f32.mrb[62].mxu0 }
 0x38e   :  { %1621 = vst [vmem:[#allocation2 + $0x50] sm:$0xff] %v1605_v47  ;;  %v1606_v40 = vmul.f32 %v2069_v28, %v1573_v41  ;;  %v1915_v43 = vpop.f32.mrb[63].mxu0 }
 0x38f   :  { %v1477_v5 = vadd.f32 %v1913_v19, %v2811_v50  ;;  %v1916_v12 = vadd.f32 %v1915_v43, %v1914_v38 }
 0x390   :  { %1622 = vst [vmem:[#allocation2 + $0x58] sm:$0xff] %v1606_v40 }
 0x391   :  { %2074 = vtanh.f32 %v1477_v5  ;;  %v1480_v18 = vadd.f32 %v1916_v12, %v2813_v25 }
 0x393   :  { %v2071_v63 = vpop.eup %2070  ;;  %2076 = vtanh.f32 %v1480_v18 }
 0x394   :  { %v1607_v17 = vmul.f32 %v2071_v63, %v1578_v45 }
 0x395   :  { %v2073_v48 = vpop.eup %2072 }
 0x396   :  { %1623 = vst [vmem:[#allocation2 + $0x60] sm:$0xff] %v1607_v17  ;;  %v1608_v49 = vmul.f32 %v2073_v48, %v1583_v60 }
 0x398   :  { %1624 = vst [vmem:[#allocation2 + $0x68] sm:$0xff] %v1608_v49 }
 0x39b   :  { %v2075_v51 = vpop.eup %2074 }
 0x39c   :  { %v1609_v52 = vmul.f32 %v2075_v51, %v1588_v32 }
 0x39d   :  { %v2077_v50 = vpop.eup %2076 }
 0x39e   :  { %1625 = vst [vmem:[#allocation2 + $0x70] sm:$0xff] %v1609_v52  ;;  %v1610_v59 = vmul.f32 %v2077_v50, %v1593_v58 }
 0x3a0   :  { %1626 = vst [vmem:[#allocation2 + $0x78] sm:$0xff] %v1610_v59 }
 0x3a1   :  { %2089 = shalt.err (!%p2086_p4)
}
 0x3a2   :  { %s2090_s19 = scalar_lea.hbm %s2844_s8, 2048 }
 0x3a3   :  { %p2091_p5 = scmp.ne.s32.totalorder %s2844_s8, %s2090_s19  ;;  %p2094_p6 = scmp.lt.u32.totalorder %s2090_s19, %s2844_s8 }
 0x3a5   :  { %p2096_p7 = pnand %p2094_p6, %p2091_p5 }
 0x3a7   :  { %2099 = shalt.err (!%p2096_p7)
}
 0x3a8   :  { %s2104_s24 = smov 128   ;;  %s2105_s25 = smov 8  }
 0x3a9   :  { %1638 = dma.vmem_to_hbm [thread:$0]  %s1633_s16, 2048, %s2844_s8, [#allocation3], %s2104_s24, %s2104_s24, %s2105_s25  }
 0x3aa   :  { %2100 = dma.done.wait [#allocation3], 2048  }
 0x3ab   :  { %2101 = vsyncadd [#allocation3], 4294965248 }
 0x3ac   :  { %1642 = vsyncpa [#allocation3], 1 }

</bundles_post_ra>
